<compile_context>
chip_gen: v7x
topology: tpu7x:2x2x1
jax: 0.10.0
libtpu: 0.0.40
codegen_flags: <defaults>
</compile_context>

<pallas_src>
import functools

import jax
import jax.numpy as jnp
from jax import lax
from jax.experimental import pallas as pl
from jax.experimental.pallas import tpu as pltpu

LN_EPS = 1e-5  # torch LayerNorm default; CLIPConfig.layer_norm_eps default is 1e-5 too


# ----------------------------- small math helpers (usable in-kernel) -----------------------------

def _erf(x):
    # Abramowitz-Stegun 7.1.26 polynomial approximation, |error| < 1.5e-7.
    p = 0.3275911
    a1, a2, a3, a4, a5 = 0.254829592, -0.284496736, 1.421413741, -1.453152027, 1.061405429
    ax = jnp.abs(x)
    t = 1.0 / (1.0 + p * ax)
    poly = ((((a5 * t + a4) * t + a3) * t + a2) * t + a1) * t
    y = 1.0 - poly * jnp.exp(-ax * ax)
    return jnp.where(x >= 0, y, -y)


def _gelu_erf(x):
    # nn.GELU() default (exact erf form)
    return 0.5 * x * (1.0 + _erf(x * 0.7071067811865476))


def _layernorm(x, w, b, eps=LN_EPS):
    mu = jnp.mean(x, axis=-1, keepdims=True)
    xc = x - mu
    var = jnp.mean(xc * xc, axis=-1, keepdims=True)
    return xc * lax.rsqrt(var + eps) * w + b


# ----------------------------- fused encoder-layer kernel (per batch element) -----------------------------

def encoder_layer_kernel(hid_ref, inst_ref,
                         ir_lnw_ref, ir_lnb_ref, ir_w1_ref, ir_w2_ref,
                         ln1w_ref, ln1b_ref,
                         wqkv_ref, bqkv_ref,
                         woe_ref, boe_ref,
                         ln2w_ref, ln2b_ref,
                         wfc1_ref, bfc1_ref, wfc2_ref, bfc2_ref,
                         out_ref,
                         *, num_heads, head_dim):
    bf16 = jnp.bfloat16
    D = num_heads * head_dim

    x = hid_ref[0]          # (S, D)   original hidden states (residual)
    inst = inst_ref[0]      # (M, Di)  raw instruction states
    S = x.shape[0]

    # ---- instruct_dim_reduce: LN(Di) -> Linear(Di,D, no bias) -> GELU -> Linear(D,D, no bias) ----
    g = _layernorm(inst, ir_lnw_ref[...], ir_lnb_ref[...])
    g = jnp.dot(g.astype(bf16), ir_w1_ref[...], preferred_element_type=jnp.float32)
    g = _gelu_erf(g)
    kv = jnp.dot(g.astype(bf16), ir_w2_ref[...], preferred_element_type=jnp.float32)   # (M, D)

    # ---- layer_norm1 + ONE fused QKV projection over the concatenated sequence ----
    h = _layernorm(x, ln1w_ref[...], ln1b_ref[...])                  # (S, D)
    cat = jnp.concatenate([h, kv], axis=0)                           # (T, D); key order is softmax-invariant
    qkv = jnp.dot(cat.astype(bf16), wqkv_ref[...],
                  preferred_element_type=jnp.float32) + bqkv_ref[...]  # (T, 3D)

    q = qkv[0:S, 0:D]                       # (S, D)  queries only needed for hidden rows; scale pre-folded
    k = qkv[:, D:2 * D].astype(bf16)        # (T, D)
    v = qkv[:, 2 * D:3 * D].astype(bf16)    # (T, D)

    wo = woe_ref[...]                       # (D, D) bf16 -- wo + tanh(gate) * wio, folded in the wrapper

    dn = (((1,), (1,)), ((), ()))           # q @ k^T without an explicit transpose
    acc = jnp.zeros((S, D), jnp.float32)    # attention output already passed through the fused out_proj
    for hh in range(num_heads):             # statically unrolled per-head attention
        sl = slice(hh * head_dim, (hh + 1) * head_dim)
        qh = q[:, sl].astype(bf16)                                                        # (S, dh)
        s = lax.dot_general(qh, k[:, sl], dn, preferred_element_type=jnp.float32)         # (S, T)
        e = jnp.exp(s - jnp.max(s, axis=-1, keepdims=True))
        prob = e * pl.reciprocal(jnp.sum(e, axis=-1, keepdims=True), approx=True)
        ctx = jnp.dot(prob.astype(bf16), v[:, sl], preferred_element_type=jnp.float32)    # (S, dh)
        # fused (out_proj + tanh(gate) * instruction_out_proj) slab for this head -> full-lane (S, D)
        acc = acc + jnp.dot(ctx.astype(bf16), wo[sl, :], preferred_element_type=jnp.float32)

    h1 = x + acc + boe_ref[...]             # residual 1 (attention + fused output-projection bias)

    # ---- layer_norm2 + CLIPMLP (quick_gelu) + residual 2 ----
    h2 = _layernorm(h1, ln2w_ref[...], ln2b_ref[...])
    f = jnp.dot(h2.astype(bf16), wfc1_ref[...], preferred_element_type=jnp.float32) + bfc1_ref[...]
    f = f * jax.nn.sigmoid(1.702 * f)       # quick_gelu
    f = jnp.dot(f.astype(bf16), wfc2_ref[...], preferred_element_type=jnp.float32) + bfc2_ref[...]

    out_ref[0] = h1 + f


# ----------------------------- wrapper -----------------------------

def mm_clip_encoder_layer(hidden_states, instruct_states, p, *, num_heads):
    # NOTE: attention_mask / causal_attention_mask / kv_masks are never applied in the reference
    # forward, so this wrapper intentionally does not accept them.
    B, S, D = hidden_states.shape
    _, M, Di = instruct_states.shape
    head_dim = D // num_heads
    I = p["fc1_w"].shape[1]
    T = M + S
    bf16 = jnp.bfloat16
    scale = head_dim ** -0.5

    # ---- inference-time parameter folding (done once, outside the grid) ----
    wqkv = jnp.concatenate([p["wq"] * scale, p["wk"], p["wv"]], axis=1).astype(bf16)   # (D, 3D)
    bqkv = jnp.concatenate([p["bq"] * scale, p["bk"], p["bv"]], axis=1)                # (1, 3D) f32
    gate_val = jnp.tanh(p["gate"][0, 0])
    wo_eff = (p["wo"] + gate_val * p["wio"]).astype(bf16)                              # (D, D)
    bo_eff = p["bo"] + gate_val * p["bio"]                                             # (1, D) f32
    ir_w1 = p["ir_w1"].astype(bf16)
    ir_w2 = p["ir_w2"].astype(bf16)
    fc1_w = p["fc1_w"].astype(bf16)
    fc2_w = p["fc2_w"].astype(bf16)

    def _rep(shape):
        # parameter replicated across the batch grid (constant index_map -> no re-fetch per step)
        n = len(shape)
        return pl.BlockSpec(shape, lambda b, _n=n: (0,) * _n)

    in_specs = [
        pl.BlockSpec((1, S, D), lambda b: (b, 0, 0)),    # hidden_states
        pl.BlockSpec((1, M, Di), lambda b: (b, 0, 0)),   # instruct_states
        _rep((1, Di)), _rep((1, Di)),                    # instruct_dim_reduce LayerNorm w, b
        _rep((Di, D)), _rep((D, D)),                     # instruct_dim_reduce Linear1, Linear2
        _rep((1, D)), _rep((1, D)),                      # layer_norm1 w, b
        _rep((D, 3 * D)), _rep((1, 3 * D)),              # fused QKV weight, bias
        _rep((D, D)), _rep((1, D)),                      # fused (gated) output projection
        _rep((1, D)), _rep((1, D)),                      # layer_norm2 w, b
        _rep((D, I)), _rep((1, I)),                      # mlp.fc1
        _rep((I, D)), _rep((1, D)),                      # mlp.fc2
    ]

    kernel = functools.partial(encoder_layer_kernel, num_heads=num_heads, head_dim=head_dim)

    flops = 2 * B * (M * Di * D + M * D * D              # instruct_dim_reduce
                     + T * D * 3 * D                     # fused QKV
                     + 2 * S * T * D                     # attention logits + P@V
                     + S * D * D                         # fused output projection
                     + 2 * S * D * I)                    # MLP
    transcendentals = B * (num_heads * S * T + S * I + M * D)
    bytes_accessed = (2 * (wqkv.size + wo_eff.size + ir_w1.size + ir_w2.size + fc1_w.size + fc2_w.size)
                      + 4 * (bqkv.size + bo_eff.size + 2 * D + 2 * Di + I + D)
                      + 4 * (2 * hidden_states.size + instruct_states.size))
    cost = pl.CostEstimate(flops=int(flops), transcendentals=int(transcendentals),
                           bytes_accessed=int(bytes_accessed))

    out = pl.pallas_call(
        kernel,
        out_shape=jax.ShapeDtypeStruct((B, S, D), jnp.float32),
        grid_spec=pltpu.PrefetchScalarGridSpec(
            num_scalar_prefetch=0,
            grid=(B,),
            in_specs=in_specs,
            out_specs=pl.BlockSpec((1, S, D), lambda b: (b, 0, 0)),
        ),
        compiler_params=pltpu.CompilerParams(
            dimension_semantics=("parallel",),           # v7x: shard batch across the 2 TensorCores
            vmem_limit_bytes=64 * 1024 * 1024,           # explicit budget (bf16 weights keep prod sizes in range)
        ),
        cost_estimate=cost,
    )(hidden_states, instruct_states,
      p["ir_ln_w"], p["ir_ln_b"], ir_w1, ir_w2,
      p["ln1_w"], p["ln1_b"],
      wqkv, bqkv, wo_eff, bo_eff,
      p["ln2_w"], p["ln2_b"],
      fc1_w, p["fc1_b"], fc2_w, p["fc2_b"])
    return out


# ----------------------------- pure-JAX f32 reference (mirrors the PyTorch forward) -----------------------------

def reference_forward(hidden, instruct, p, *, num_heads):
    B, S, D = hidden.shape
    M = instruct.shape[1]
    head_dim = D // num_heads
    scale = head_dim ** -0.5

    def ln(x, w, b):
        mu = x.mean(-1, keepdims=True)
        var = ((x - mu) ** 2).mean(-1, keepdims=True)
        return (x - mu) / jnp.sqrt(var + LN_EPS) * w + b

    # instruct_dim_reduce
    kvh = ln(instruct, p["ir_ln_w"][0], p["ir_ln_b"][0])
    kvh = _gelu_erf(kvh @ p["ir_w1"])
    kv = kvh @ p["ir_w2"]

    residual = hidden
    h = ln(hidden, p["ln1_w"][0], p["ln1_b"][0])
    cat = jnp.concatenate([kv, h], axis=1)                       # (B, M+S, D)
    q = (cat @ p["wq"] + p["bq"][0]) * scale
    k = cat @ p["wk"] + p["bk"][0]
    v = cat @ p["wv"] + p["bv"][0]

    def heads(t):
        return t.reshape(B, M + S, num_heads, head_dim).transpose(0, 2, 1, 3)

    qh, kh, vh = heads(q), heads(k), heads(v)
    attw = jnp.einsum("bhqd,bhkd->bhqk", qh, kh)
    attw = attw[:, :, M:, :]                                     # drop instruction queries
    attw = jax.nn.softmax(attw, axis=-1)
    out = jnp.einsum("bhqk,bhkd->bhqd", attw, vh)
    out = out.transpose(0, 2, 1, 3).reshape(B, S, D)
    gate_val = jnp.tanh(p["gate"][0, 0])
    out = out @ p["wo"] + p["bo"][0] + (out @ p["wio"] + p["bio"][0]) * gate_val

    h1 = residual + out
    h2 = ln(h1, p["ln2_w"][0], p["ln2_b"][0])
    f = h2 @ p["fc1_w"] + p["fc1_b"][0]
    f = f * jax.nn.sigmoid(1.702 * f)
    f = f @ p["fc2_w"] + p["fc2_b"][0]
    return h1 + f


# ----------------------------- main -----------------------------

if __name__ == "__main__":
    B, S, D = 2, 8, 32            # batch, seq_len, hidden_size
    H = 4                         # num_attention_heads (head_dim = 8)
    M, Di = 4, 16                 # instruction seq len, instruction_dim
    I = 64                        # intermediate_size

    key = jax.random.PRNGKey(0)
    ks = iter(jax.random.split(key, 32))
    f32 = jnp.float32

    def w(shape, scale=0.05):
        return (scale * jax.random.normal(next(ks), shape)).astype(f32)

    params = {
        # instruct_dim_reduce: LN(Di) -> Linear(Di,D,no bias) -> GELU -> Linear(D,D,no bias)
        "ir_ln_w": (1.0 + 0.1 * jax.random.normal(next(ks), (1, Di))).astype(f32),
        "ir_ln_b": w((1, Di), 0.1),
        "ir_w1": w((Di, D)),
        "ir_w2": w((D, D)),
        # encoder layer
        "ln1_w": (1.0 + 0.1 * jax.random.normal(next(ks), (1, D))).astype(f32),
        "ln1_b": w((1, D), 0.1),
        "wq": w((D, D)), "bq": w((1, D), 0.02),
        "wk": w((D, D)), "bk": w((1, D), 0.02),
        "wv": w((D, D)), "bv": w((1, D), 0.02),
        "wo": w((D, D)), "bo": w((1, D), 0.02),
        "wio": w((D, D)), "bio": w((1, D), 0.02),
        "gate": jnp.full((1, 1), 0.5, dtype=f32),   # instruction_proj_gate (nonzero so the branch is exercised)
        "ln2_w": (1.0 + 0.1 * jax.random.normal(next(ks), (1, D))).astype(f32),
        "ln2_b": w((1, D), 0.1),
        "fc1_w": w((D, I)), "fc1_b": w((1, I), 0.02),
        "fc2_w": w((I, D)), "fc2_b": w((1, D), 0.02),
    }

    hidden_states = jax.random.normal(next(ks), (B, S, D), dtype=f32)
    instruct_states = jax.random.normal(next(ks), (B, M, Di), dtype=f32)

    out = mm_clip_encoder_layer(hidden_states, instruct_states, params, num_heads=H)
    out = jax.block_until_ready(out)

    ref = reference_forward(hidden_states, instruct_states, params, num_heads=H)
    max_diff = float(jnp.max(jnp.abs(out - ref)))
    # Kernel matmuls use bf16 operands with f32 accumulation (plus approx reciprocal in softmax),
    # while the reference is pure f32, so allow a bf16-level tolerance.
    assert max_diff < 2e-2, f"mismatch vs reference: max abs diff = {max_diff}"

    print("KERNEL_OK")
</pallas_src>

<mosaic_0001>
module attributes {stable_mosaic.version = 11 : i64} {
  func.func @encoder_layer_kernel(%arg0: i32, %arg1: memref<1x8x32xf32, #tpu.memory_space<vmem>>, %arg2: memref<1x4x16xf32, #tpu.memory_space<vmem>>, %arg3: memref<1x16xf32, #tpu.memory_space<vmem>>, %arg4: memref<1x16xf32, #tpu.memory_space<vmem>>, %arg5: memref<16x32xbf16, #tpu.memory_space<vmem>>, %arg6: memref<32x32xbf16, #tpu.memory_space<vmem>>, %arg7: memref<1x32xf32, #tpu.memory_space<vmem>>, %arg8: memref<1x32xf32, #tpu.memory_space<vmem>>, %arg9: memref<32x96xbf16, #tpu.memory_space<vmem>>, %arg10: memref<1x96xf32, #tpu.memory_space<vmem>>, %arg11: memref<32x32xbf16, #tpu.memory_space<vmem>>, %arg12: memref<1x32xf32, #tpu.memory_space<vmem>>, %arg13: memref<1x32xf32, #tpu.memory_space<vmem>>, %arg14: memref<1x32xf32, #tpu.memory_space<vmem>>, %arg15: memref<32x64xbf16, #tpu.memory_space<vmem>>, %arg16: memref<1x64xf32, #tpu.memory_space<vmem>>, %arg17: memref<64x32xbf16, #tpu.memory_space<vmem>>, %arg18: memref<1x32xf32, #tpu.memory_space<vmem>>, %arg19: memref<1x8x32xf32, #tpu.memory_space<vmem>>) attributes {dimension_semantics = [#tpu.dimension_semantics<parallel>], iteration_bounds = array<i64: 2>, scalar_prefetch = 0 : i64, scratch_operands = 0 : i64, tpu.core_type = #tpu.core_type<tc>, window_params = [{transform_indices = @transform_0, window_bounds = array<i64: 1, 8, 32>}, {transform_indices = @transform_1, window_bounds = array<i64: 1, 4, 16>}, {pipeline_mode = #tpu.pipeline_mode<synchronous>, transform_indices = @transform_2, window_bounds = array<i64: 1, 16>}, {pipeline_mode = #tpu.pipeline_mode<synchronous>, transform_indices = @transform_3, window_bounds = array<i64: 1, 16>}, {pipeline_mode = #tpu.pipeline_mode<synchronous>, transform_indices = @transform_4, window_bounds = array<i64: 16, 32>}, {pipeline_mode = #tpu.pipeline_mode<synchronous>, transform_indices = @transform_5, window_bounds = array<i64: 32, 32>}, {pipeline_mode = #tpu.pipeline_mode<synchronous>, transform_indices = @transform_6, window_bounds = array<i64: 1, 32>}, {pipeline_mode = #tpu.pipeline_mode<synchronous>, transform_indices = @transform_7, window_bounds = array<i64: 1, 32>}, {pipeline_mode = #tpu.pipeline_mode<synchronous>, transform_indices = @transform_8, window_bounds = array<i64: 32, 96>}, {pipeline_mode = #tpu.pipeline_mode<synchronous>, transform_indices = @transform_9, window_bounds = array<i64: 1, 96>}, {pipeline_mode = #tpu.pipeline_mode<synchronous>, transform_indices = @transform_10, window_bounds = array<i64: 32, 32>}, {pipeline_mode = #tpu.pipeline_mode<synchronous>, transform_indices = @transform_11, window_bounds = array<i64: 1, 32>}, {pipeline_mode = #tpu.pipeline_mode<synchronous>, transform_indices = @transform_12, window_bounds = array<i64: 1, 32>}, {pipeline_mode = #tpu.pipeline_mode<synchronous>, transform_indices = @transform_13, window_bounds = array<i64: 1, 32>}, {pipeline_mode = #tpu.pipeline_mode<synchronous>, transform_indices = @transform_14, window_bounds = array<i64: 32, 64>}, {pipeline_mode = #tpu.pipeline_mode<synchronous>, transform_indices = @transform_15, window_bounds = array<i64: 1, 64>}, {pipeline_mode = #tpu.pipeline_mode<synchronous>, transform_indices = @transform_16, window_bounds = array<i64: 64, 32>}, {pipeline_mode = #tpu.pipeline_mode<synchronous>, transform_indices = @transform_17, window_bounds = array<i64: 1, 32>}, {transform_indices = @transform_18, window_bounds = array<i64: 1, 8, 32>}]} {
    %c0 = arith.constant 0 : index
    %c0_0 = arith.constant 0 : index
    %c0_1 = arith.constant 0 : index
    %0 = vector.load %arg1[%c0, %c0_0, %c0_1] : memref<1x8x32xf32, #tpu.memory_space<vmem>>, vector<1x8x32xf32>
    %1 = vector.shape_cast %0 : vector<1x8x32xf32> to vector<8x32xf32>
    %c0_2 = arith.constant 0 : index
    %c0_3 = arith.constant 0 : index
    %c0_4 = arith.constant 0 : index
    %2 = vector.load %arg2[%c0_2, %c0_3, %c0_4] : memref<1x4x16xf32, #tpu.memory_space<vmem>>, vector<1x4x16xf32>
    %3 = vector.shape_cast %2 : vector<1x4x16xf32> to vector<4x16xf32>
    %c0_5 = arith.constant 0 : index
    %c0_6 = arith.constant 0 : index
    %4 = vector.load %arg3[%c0_5, %c0_6] : memref<1x16xf32, #tpu.memory_space<vmem>>, vector<1x16xf32>
    %c0_7 = arith.constant 0 : index
    %c0_8 = arith.constant 0 : index
    %5 = vector.load %arg4[%c0_7, %c0_8] : memref<1x16xf32, #tpu.memory_space<vmem>>, vector<1x16xf32>
    %cst = arith.constant dense<0.000000e+00> : vector<4xf32>
    %6 = vector.multi_reduction <add>, %3, %cst [1] : vector<4x16xf32> to vector<4xf32>
    %7 = vector.shape_cast %6 : vector<4xf32> to vector<4x1xf32>
    %cst_9 = arith.constant 1.600000e+01 : f32
    %8 = vector.broadcast %cst_9 : f32 to vector<4x1xf32>
    %9 = arith.divf %7, %8 : vector<4x1xf32>
    %10 = vector.broadcast %9 : vector<4x1xf32> to vector<4x16xf32>
    %11 = arith.subf %3, %10 : vector<4x16xf32>
    %12 = arith.mulf %11, %11 : vector<4x16xf32>
    %cst_10 = arith.constant dense<0.000000e+00> : vector<4xf32>
    %13 = vector.multi_reduction <add>, %12, %cst_10 [1] : vector<4x16xf32> to vector<4xf32>
    %14 = vector.shape_cast %13 : vector<4xf32> to vector<4x1xf32>
    %cst_11 = arith.constant 1.600000e+01 : f32
    %15 = vector.broadcast %cst_11 : f32 to vector<4x1xf32>
    %16 = arith.divf %14, %15 : vector<4x1xf32>
    %cst_12 = arith.constant 9.99999974E-6 : f32
    %17 = vector.broadcast %cst_12 : f32 to vector<4x1xf32>
    %18 = arith.addf %16, %17 : vector<4x1xf32>
    %19 = math.rsqrt %18 : vector<4x1xf32>
    %20 = vector.broadcast %19 : vector<4x1xf32> to vector<4x16xf32>
    %21 = arith.mulf %11, %20 : vector<4x16xf32>
    %22 = vector.broadcast %4 : vector<1x16xf32> to vector<4x16xf32>
    %23 = arith.mulf %21, %22 : vector<4x16xf32>
    %24 = vector.broadcast %5 : vector<1x16xf32> to vector<4x16xf32>
    %25 = arith.addf %23, %24 : vector<4x16xf32>
    %26 = arith.truncf %25 : vector<4x16xf32> to vector<4x16xbf16>
    %c0_13 = arith.constant 0 : index
    %c0_14 = arith.constant 0 : index
    %27 = vector.load %arg5[%c0_13, %c0_14] : memref<16x32xbf16, #tpu.memory_space<vmem>>, vector<16x32xbf16>
    %cst_15 = arith.constant dense<0.000000e+00> : vector<4x32xf32>
    %28 = tpu.matmul %26, %27, %cst_15 {dimension_numbers = #tpu.dot_dimension_numbers<[1], [0], [0], [1], [0, 0, 1, 1], [], []>} : vector<4x16xbf16>, vector<16x32xbf16>, vector<4x32xf32> -> vector<4x32xf32>
    %cst_16 = arith.constant 5.000000e-01 : f32
    %29 = vector.broadcast %cst_16 : f32 to vector<4x32xf32>
    %30 = arith.mulf %29, %28 : vector<4x32xf32>
    %cst_17 = arith.constant 0.707106769 : f32
    %31 = vector.broadcast %cst_17 : f32 to vector<4x32xf32>
    %32 = arith.mulf %28, %31 : vector<4x32xf32>
    %33 = math.absf %32 : vector<4x32xf32>
    %cst_18 = arith.constant 0.327591091 : f32
    %34 = vector.broadcast %cst_18 : f32 to vector<4x32xf32>
    %35 = arith.mulf %34, %33 : vector<4x32xf32>
    %cst_19 = arith.constant 1.000000e+00 : f32
    %36 = vector.broadcast %cst_19 : f32 to vector<4x32xf32>
    %37 = arith.addf %36, %35 : vector<4x32xf32>
    %cst_20 = arith.constant 1.000000e+00 : f32
    %38 = vector.broadcast %cst_20 : f32 to vector<4x32xf32>
    %39 = arith.divf %38, %37 : vector<4x32xf32>
    %cst_21 = arith.constant 1.06140542 : f32
    %40 = vector.broadcast %cst_21 : f32 to vector<4x32xf32>
    %41 = arith.mulf %40, %39 : vector<4x32xf32>
    %cst_22 = arith.constant -1.45315206 : f32
    %42 = vector.broadcast %cst_22 : f32 to vector<4x32xf32>
    %43 = arith.addf %41, %42 : vector<4x32xf32>
    %44 = arith.mulf %43, %39 : vector<4x32xf32>
    %cst_23 = arith.constant 1.42141378 : f32
    %45 = vector.broadcast %cst_23 : f32 to vector<4x32xf32>
    %46 = arith.addf %44, %45 : vector<4x32xf32>
    %47 = arith.mulf %46, %39 : vector<4x32xf32>
    %cst_24 = arith.constant -0.284496725 : f32
    %48 = vector.broadcast %cst_24 : f32 to vector<4x32xf32>
    %49 = arith.addf %47, %48 : vector<4x32xf32>
    %50 = arith.mulf %49, %39 : vector<4x32xf32>
    %cst_25 = arith.constant 0.254829586 : f32
    %51 = vector.broadcast %cst_25 : f32 to vector<4x32xf32>
    %52 = arith.addf %50, %51 : vector<4x32xf32>
    %53 = arith.mulf %52, %39 : vector<4x32xf32>
    %cst_26 = arith.constant 0.000000e+00 : f32
    %54 = vector.broadcast %cst_26 : f32 to vector<4x32xf32>
    %55 = arith.subf %54, %33 : vector<4x32xf32>
    %56 = arith.mulf %55, %33 : vector<4x32xf32>
    %57 = math.exp %56 : vector<4x32xf32>
    %58 = arith.mulf %53, %57 : vector<4x32xf32>
    %cst_27 = arith.constant 1.000000e+00 : f32
    %59 = vector.broadcast %cst_27 : f32 to vector<4x32xf32>
    %60 = arith.subf %59, %58 : vector<4x32xf32>
    %cst_28 = arith.constant 0.000000e+00 : f32
    %61 = vector.broadcast %cst_28 : f32 to vector<4x32xf32>
    %62 = arith.cmpf oge, %32, %61 : vector<4x32xf32>
    %cst_29 = arith.constant 0.000000e+00 : f32
    %63 = vector.broadcast %cst_29 : f32 to vector<4x32xf32>
    %64 = arith.subf %63, %60 : vector<4x32xf32>
    %65 = arith.select %62, %60, %64 : vector<4x32xi1>, vector<4x32xf32>
    %cst_30 = arith.constant 1.000000e+00 : f32
    %66 = vector.broadcast %cst_30 : f32 to vector<4x32xf32>
    %67 = arith.addf %66, %65 : vector<4x32xf32>
    %68 = arith.mulf %30, %67 : vector<4x32xf32>
    %69 = arith.truncf %68 : vector<4x32xf32> to vector<4x32xbf16>
    %c0_31 = arith.constant 0 : index
    %c0_32 = arith.constant 0 : index
    %70 = vector.load %arg6[%c0_31, %c0_32] : memref<32x32xbf16, #tpu.memory_space<vmem>>, vector<32x32xbf16>
    %cst_33 = arith.constant dense<0.000000e+00> : vector<4x32xf32>
    %71 = tpu.matmul %69, %70, %cst_33 {dimension_numbers = #tpu.dot_dimension_numbers<[1], [0], [0], [1], [0, 0, 1, 1], [], []>} : vector<4x32xbf16>, vector<32x32xbf16>, vector<4x32xf32> -> vector<4x32xf32>
    %c0_34 = arith.constant 0 : index
    %c0_35 = arith.constant 0 : index
    %72 = vector.load %arg7[%c0_34, %c0_35] : memref<1x32xf32, #tpu.memory_space<vmem>>, vector<1x32xf32>
    %c0_36 = arith.constant 0 : index
    %c0_37 = arith.constant 0 : index
    %73 = vector.load %arg8[%c0_36, %c0_37] : memref<1x32xf32, #tpu.memory_space<vmem>>, vector<1x32xf32>
    %cst_38 = arith.constant dense<0.000000e+00> : vector<8xf32>
    %74 = vector.multi_reduction <add>, %1, %cst_38 [1] : vector<8x32xf32> to vector<8xf32>
    %75 = vector.shape_cast %74 : vector<8xf32> to vector<8x1xf32>
    %cst_39 = arith.constant 3.200000e+01 : f32
    %76 = vector.broadcast %cst_39 : f32 to vector<8x1xf32>
    %77 = arith.divf %75, %76 : vector<8x1xf32>
    %78 = vector.broadcast %77 : vector<8x1xf32> to vector<8x32xf32>
    %79 = arith.subf %1, %78 : vector<8x32xf32>
    %80 = arith.mulf %79, %79 : vector<8x32xf32>
    %cst_40 = arith.constant dense<0.000000e+00> : vector<8xf32>
    %81 = vector.multi_reduction <add>, %80, %cst_40 [1] : vector<8x32xf32> to vector<8xf32>
    %82 = vector.shape_cast %81 : vector<8xf32> to vector<8x1xf32>
    %cst_41 = arith.constant 3.200000e+01 : f32
    %83 = vector.broadcast %cst_41 : f32 to vector<8x1xf32>
    %84 = arith.divf %82, %83 : vector<8x1xf32>
    %cst_42 = arith.constant 9.99999974E-6 : f32
    %85 = vector.broadcast %cst_42 : f32 to vector<8x1xf32>
    %86 = arith.addf %84, %85 : vector<8x1xf32>
    %87 = math.rsqrt %86 : vector<8x1xf32>
    %88 = vector.broadcast %87 : vector<8x1xf32> to vector<8x32xf32>
    %89 = arith.mulf %79, %88 : vector<8x32xf32>
    %90 = vector.broadcast %72 : vector<1x32xf32> to vector<8x32xf32>
    %91 = arith.mulf %89, %90 : vector<8x32xf32>
    %92 = vector.broadcast %73 : vector<1x32xf32> to vector<8x32xf32>
    %93 = arith.addf %91, %92 : vector<8x32xf32>
    %94 = tpu.concatenate %93, %71 in 0 : vector<8x32xf32>, vector<4x32xf32> -> vector<12x32xf32>
    %95 = arith.truncf %94 : vector<12x32xf32> to vector<12x32xbf16>
    %c0_43 = arith.constant 0 : index
    %c0_44 = arith.constant 0 : index
    %96 = vector.load %arg9[%c0_43, %c0_44] : memref<32x96xbf16, #tpu.memory_space<vmem>>, vector<32x96xbf16>
    %cst_45 = arith.constant dense<0.000000e+00> : vector<12x96xf32>
    %97 = tpu.matmul %95, %96, %cst_45 {dimension_numbers = #tpu.dot_dimension_numbers<[1], [0], [0], [1], [0, 0, 1, 1], [], []>} : vector<12x32xbf16>, vector<32x96xbf16>, vector<12x96xf32> -> vector<12x96xf32>
    %c0_46 = arith.constant 0 : index
    %c0_47 = arith.constant 0 : index
    %98 = vector.load %arg10[%c0_46, %c0_47] : memref<1x96xf32, #tpu.memory_space<vmem>>, vector<1x96xf32>
    %99 = vector.broadcast %98 : vector<1x96xf32> to vector<12x96xf32>
    %100 = arith.addf %97, %99 : vector<12x96xf32>
    %101 = vector.extract_strided_slice %100 {offsets = [0, 0], sizes = [8, 32], strides = [1, 1]} : vector<12x96xf32> to vector<8x32xf32>
    %102 = vector.extract_strided_slice %100 {offsets = [0, 32], sizes = [12, 32], strides = [1, 1]} : vector<12x96xf32> to vector<12x32xf32>
    %103 = arith.truncf %102 : vector<12x32xf32> to vector<12x32xbf16>
    %104 = vector.extract_strided_slice %100 {offsets = [0, 64], sizes = [12, 32], strides = [1, 1]} : vector<12x96xf32> to vector<12x32xf32>
    %105 = arith.truncf %104 : vector<12x32xf32> to vector<12x32xbf16>
    %c0_48 = arith.constant 0 : index
    %c0_49 = arith.constant 0 : index
    %106 = vector.load %arg11[%c0_48, %c0_49] : memref<32x32xbf16, #tpu.memory_space<vmem>>, vector<32x32xbf16>
    %cst_50 = arith.constant 0.000000e+00 : f32
    %107 = vector.broadcast %cst_50 : f32 to vector<8x32xf32>
    %108 = vector.extract_strided_slice %101 {offsets = [0, 0], sizes = [8, 8], strides = [1, 1]} : vector<8x32xf32> to vector<8x8xf32>
    %109 = arith.truncf %108 : vector<8x8xf32> to vector<8x8xbf16>
    %110 = vector.extract_strided_slice %103 {offsets = [0, 0], sizes = [12, 8], strides = [1, 1]} : vector<12x32xbf16> to vector<12x8xbf16>
    %cst_51 = arith.constant dense<0.000000e+00> : vector<8x12xf32>
    %111 = tpu.matmul %109, %110, %cst_51 {dimension_numbers = #tpu.dot_dimension_numbers<[1], [1], [0], [0], [0, 0, 1, 0], [], []>} : vector<8x8xbf16>, vector<12x8xbf16>, vector<8x12xf32> -> vector<8x12xf32>
    %cst_52 = arith.constant dense<0xFF800000> : vector<8xf32>
    %112 = vector.multi_reduction <maximumf>, %111, %cst_52 [1] : vector<8x12xf32> to vector<8xf32>
    %113 = vector.shape_cast %112 : vector<8xf32> to vector<8x1xf32>
    %114 = vector.broadcast %113 : vector<8x1xf32> to vector<8x12xf32>
    %115 = arith.subf %111, %114 : vector<8x12xf32>
    %116 = math.exp %115 : vector<8x12xf32>
    %cst_53 = arith.constant dense<0.000000e+00> : vector<8xf32>
    %117 = vector.multi_reduction <add>, %116, %cst_53 [1] : vector<8x12xf32> to vector<8xf32>
    %118 = vector.shape_cast %117 : vector<8xf32> to vector<8x1xf32>
    %119 = tpu.reciprocal %118 {approx = true} : vector<8x1xf32> -> vector<8x1xf32>
    %120 = vector.broadcast %119 : vector<8x1xf32> to vector<8x12xf32>
    %121 = arith.mulf %116, %120 : vector<8x12xf32>
    %122 = arith.truncf %121 : vector<8x12xf32> to vector<8x12xbf16>
    %123 = vector.extract_strided_slice %105 {offsets = [0, 0], sizes = [12, 8], strides = [1, 1]} : vector<12x32xbf16> to vector<12x8xbf16>
    %cst_54 = arith.constant dense<0.000000e+00> : vector<8x8xf32>
    %124 = tpu.matmul %122, %123, %cst_54 {dimension_numbers = #tpu.dot_dimension_numbers<[1], [0], [0], [1], [0, 0, 1, 1], [], []>} : vector<8x12xbf16>, vector<12x8xbf16>, vector<8x8xf32> -> vector<8x8xf32>
    %125 = arith.truncf %124 : vector<8x8xf32> to vector<8x8xbf16>
    %126 = vector.extract_strided_slice %106 {offsets = [0, 0], sizes = [8, 32], strides = [1, 1]} : vector<32x32xbf16> to vector<8x32xbf16>
    %cst_55 = arith.constant dense<0.000000e+00> : vector<8x32xf32>
    %127 = tpu.matmul %125, %126, %cst_55 {dimension_numbers = #tpu.dot_dimension_numbers<[1], [0], [0], [1], [0, 0, 1, 1], [], []>} : vector<8x8xbf16>, vector<8x32xbf16>, vector<8x32xf32> -> vector<8x32xf32>
    %128 = arith.addf %107, %127 : vector<8x32xf32>
    %129 = vector.extract_strided_slice %101 {offsets = [0, 8], sizes = [8, 8], strides = [1, 1]} : vector<8x32xf32> to vector<8x8xf32>
    %130 = arith.truncf %129 : vector<8x8xf32> to vector<8x8xbf16>
    %131 = vector.extract_strided_slice %103 {offsets = [0, 8], sizes = [12, 8], strides = [1, 1]} : vector<12x32xbf16> to vector<12x8xbf16>
    %cst_56 = arith.constant dense<0.000000e+00> : vector<8x12xf32>
    %132 = tpu.matmul %130, %131, %cst_56 {dimension_numbers = #tpu.dot_dimension_numbers<[1], [1], [0], [0], [0, 0, 1, 0], [], []>} : vector<8x8xbf16>, vector<12x8xbf16>, vector<8x12xf32> -> vector<8x12xf32>
    %cst_57 = arith.constant dense<0xFF800000> : vector<8xf32>
    %133 = vector.multi_reduction <maximumf>, %132, %cst_57 [1] : vector<8x12xf32> to vector<8xf32>
    %134 = vector.shape_cast %133 : vector<8xf32> to vector<8x1xf32>
    %135 = vector.broadcast %134 : vector<8x1xf32> to vector<8x12xf32>
    %136 = arith.subf %132, %135 : vector<8x12xf32>
    %137 = math.exp %136 : vector<8x12xf32>
    %cst_58 = arith.constant dense<0.000000e+00> : vector<8xf32>
    %138 = vector.multi_reduction <add>, %137, %cst_58 [1] : vector<8x12xf32> to vector<8xf32>
    %139 = vector.shape_cast %138 : vector<8xf32> to vector<8x1xf32>
    %140 = tpu.reciprocal %139 {approx = true} : vector<8x1xf32> -> vector<8x1xf32>
    %141 = vector.broadcast %140 : vector<8x1xf32> to vector<8x12xf32>
    %142 = arith.mulf %137, %141 : vector<8x12xf32>
    %143 = arith.truncf %142 : vector<8x12xf32> to vector<8x12xbf16>
    %144 = vector.extract_strided_slice %105 {offsets = [0, 8], sizes = [12, 8], strides = [1, 1]} : vector<12x32xbf16> to vector<12x8xbf16>
    %cst_59 = arith.constant dense<0.000000e+00> : vector<8x8xf32>
    %145 = tpu.matmul %143, %144, %cst_59 {dimension_numbers = #tpu.dot_dimension_numbers<[1], [0], [0], [1], [0, 0, 1, 1], [], []>} : vector<8x12xbf16>, vector<12x8xbf16>, vector<8x8xf32> -> vector<8x8xf32>
    %146 = arith.truncf %145 : vector<8x8xf32> to vector<8x8xbf16>
    %147 = vector.extract_strided_slice %106 {offsets = [8, 0], sizes = [8, 32], strides = [1, 1]} : vector<32x32xbf16> to vector<8x32xbf16>
    %cst_60 = arith.constant dense<0.000000e+00> : vector<8x32xf32>
    %148 = tpu.matmul %146, %147, %cst_60 {dimension_numbers = #tpu.dot_dimension_numbers<[1], [0], [0], [1], [0, 0, 1, 1], [], []>} : vector<8x8xbf16>, vector<8x32xbf16>, vector<8x32xf32> -> vector<8x32xf32>
    %149 = arith.addf %128, %148 : vector<8x32xf32>
    %150 = vector.extract_strided_slice %101 {offsets = [0, 16], sizes = [8, 8], strides = [1, 1]} : vector<8x32xf32> to vector<8x8xf32>
    %151 = arith.truncf %150 : vector<8x8xf32> to vector<8x8xbf16>
    %152 = vector.extract_strided_slice %103 {offsets = [0, 16], sizes = [12, 8], strides = [1, 1]} : vector<12x32xbf16> to vector<12x8xbf16>
    %cst_61 = arith.constant dense<0.000000e+00> : vector<8x12xf32>
    %153 = tpu.matmul %151, %152, %cst_61 {dimension_numbers = #tpu.dot_dimension_numbers<[1], [1], [0], [0], [0, 0, 1, 0], [], []>} : vector<8x8xbf16>, vector<12x8xbf16>, vector<8x12xf32> -> vector<8x12xf32>
    %cst_62 = arith.constant dense<0xFF800000> : vector<8xf32>
    %154 = vector.multi_reduction <maximumf>, %153, %cst_62 [1] : vector<8x12xf32> to vector<8xf32>
    %155 = vector.shape_cast %154 : vector<8xf32> to vector<8x1xf32>
    %156 = vector.broadcast %155 : vector<8x1xf32> to vector<8x12xf32>
    %157 = arith.subf %153, %156 : vector<8x12xf32>
    %158 = math.exp %157 : vector<8x12xf32>
    %cst_63 = arith.constant dense<0.000000e+00> : vector<8xf32>
    %159 = vector.multi_reduction <add>, %158, %cst_63 [1] : vector<8x12xf32> to vector<8xf32>
    %160 = vector.shape_cast %159 : vector<8xf32> to vector<8x1xf32>
    %161 = tpu.reciprocal %160 {approx = true} : vector<8x1xf32> -> vector<8x1xf32>
    %162 = vector.broadcast %161 : vector<8x1xf32> to vector<8x12xf32>
    %163 = arith.mulf %158, %162 : vector<8x12xf32>
    %164 = arith.truncf %163 : vector<8x12xf32> to vector<8x12xbf16>
    %165 = vector.extract_strided_slice %105 {offsets = [0, 16], sizes = [12, 8], strides = [1, 1]} : vector<12x32xbf16> to vector<12x8xbf16>
    %cst_64 = arith.constant dense<0.000000e+00> : vector<8x8xf32>
    %166 = tpu.matmul %164, %165, %cst_64 {dimension_numbers = #tpu.dot_dimension_numbers<[1], [0], [0], [1], [0, 0, 1, 1], [], []>} : vector<8x12xbf16>, vector<12x8xbf16>, vector<8x8xf32> -> vector<8x8xf32>
    %167 = arith.truncf %166 : vector<8x8xf32> to vector<8x8xbf16>
    %168 = vector.extract_strided_slice %106 {offsets = [16, 0], sizes = [8, 32], strides = [1, 1]} : vector<32x32xbf16> to vector<8x32xbf16>
    %cst_65 = arith.constant dense<0.000000e+00> : vector<8x32xf32>
    %169 = tpu.matmul %167, %168, %cst_65 {dimension_numbers = #tpu.dot_dimension_numbers<[1], [0], [0], [1], [0, 0, 1, 1], [], []>} : vector<8x8xbf16>, vector<8x32xbf16>, vector<8x32xf32> -> vector<8x32xf32>
    %170 = arith.addf %149, %169 : vector<8x32xf32>
    %171 = vector.extract_strided_slice %101 {offsets = [0, 24], sizes = [8, 8], strides = [1, 1]} : vector<8x32xf32> to vector<8x8xf32>
    %172 = arith.truncf %171 : vector<8x8xf32> to vector<8x8xbf16>
    %173 = vector.extract_strided_slice %103 {offsets = [0, 24], sizes = [12, 8], strides = [1, 1]} : vector<12x32xbf16> to vector<12x8xbf16>
    %cst_66 = arith.constant dense<0.000000e+00> : vector<8x12xf32>
    %174 = tpu.matmul %172, %173, %cst_66 {dimension_numbers = #tpu.dot_dimension_numbers<[1], [1], [0], [0], [0, 0, 1, 0], [], []>} : vector<8x8xbf16>, vector<12x8xbf16>, vector<8x12xf32> -> vector<8x12xf32>
    %cst_67 = arith.constant dense<0xFF800000> : vector<8xf32>
    %175 = vector.multi_reduction <maximumf>, %174, %cst_67 [1] : vector<8x12xf32> to vector<8xf32>
    %176 = vector.shape_cast %175 : vector<8xf32> to vector<8x1xf32>
    %177 = vector.broadcast %176 : vector<8x1xf32> to vector<8x12xf32>
    %178 = arith.subf %174, %177 : vector<8x12xf32>
    %179 = math.exp %178 : vector<8x12xf32>
    %cst_68 = arith.constant dense<0.000000e+00> : vector<8xf32>
    %180 = vector.multi_reduction <add>, %179, %cst_68 [1] : vector<8x12xf32> to vector<8xf32>
    %181 = vector.shape_cast %180 : vector<8xf32> to vector<8x1xf32>
    %182 = tpu.reciprocal %181 {approx = true} : vector<8x1xf32> -> vector<8x1xf32>
    %183 = vector.broadcast %182 : vector<8x1xf32> to vector<8x12xf32>
    %184 = arith.mulf %179, %183 : vector<8x12xf32>
    %185 = arith.truncf %184 : vector<8x12xf32> to vector<8x12xbf16>
    %186 = vector.extract_strided_slice %105 {offsets = [0, 24], sizes = [12, 8], strides = [1, 1]} : vector<12x32xbf16> to vector<12x8xbf16>
    %cst_69 = arith.constant dense<0.000000e+00> : vector<8x8xf32>
    %187 = tpu.matmul %185, %186, %cst_69 {dimension_numbers = #tpu.dot_dimension_numbers<[1], [0], [0], [1], [0, 0, 1, 1], [], []>} : vector<8x12xbf16>, vector<12x8xbf16>, vector<8x8xf32> -> vector<8x8xf32>
    %188 = arith.truncf %187 : vector<8x8xf32> to vector<8x8xbf16>
    %189 = vector.extract_strided_slice %106 {offsets = [24, 0], sizes = [8, 32], strides = [1, 1]} : vector<32x32xbf16> to vector<8x32xbf16>
    %cst_70 = arith.constant dense<0.000000e+00> : vector<8x32xf32>
    %190 = tpu.matmul %188, %189, %cst_70 {dimension_numbers = #tpu.dot_dimension_numbers<[1], [0], [0], [1], [0, 0, 1, 1], [], []>} : vector<8x8xbf16>, vector<8x32xbf16>, vector<8x32xf32> -> vector<8x32xf32>
    %191 = arith.addf %170, %190 : vector<8x32xf32>
    %192 = arith.addf %1, %191 : vector<8x32xf32>
    %c0_71 = arith.constant 0 : index
    %c0_72 = arith.constant 0 : index
    %193 = vector.load %arg12[%c0_71, %c0_72] : memref<1x32xf32, #tpu.memory_space<vmem>>, vector<1x32xf32>
    %194 = vector.broadcast %193 : vector<1x32xf32> to vector<8x32xf32>
    %195 = arith.addf %192, %194 : vector<8x32xf32>
    %c0_73 = arith.constant 0 : index
    %c0_74 = arith.constant 0 : index
    %196 = vector.load %arg13[%c0_73, %c0_74] : memref<1x32xf32, #tpu.memory_space<vmem>>, vector<1x32xf32>
    %c0_75 = arith.constant 0 : index
    %c0_76 = arith.constant 0 : index
    %197 = vector.load %arg14[%c0_75, %c0_76] : memref<1x32xf32, #tpu.memory_space<vmem>>, vector<1x32xf32>
    %cst_77 = arith.constant dense<0.000000e+00> : vector<8xf32>
    %198 = vector.multi_reduction <add>, %195, %cst_77 [1] : vector<8x32xf32> to vector<8xf32>
    %199 = vector.shape_cast %198 : vector<8xf32> to vector<8x1xf32>
    %cst_78 = arith.constant 3.200000e+01 : f32
    %200 = vector.broadcast %cst_78 : f32 to vector<8x1xf32>
    %201 = arith.divf %199, %200 : vector<8x1xf32>
    %202 = vector.broadcast %201 : vector<8x1xf32> to vector<8x32xf32>
    %203 = arith.subf %195, %202 : vector<8x32xf32>
    %204 = arith.mulf %203, %203 : vector<8x32xf32>
    %cst_79 = arith.constant dense<0.000000e+00> : vector<8xf32>
    %205 = vector.multi_reduction <add>, %204, %cst_79 [1] : vector<8x32xf32> to vector<8xf32>
    %206 = vector.shape_cast %205 : vector<8xf32> to vector<8x1xf32>
    %cst_80 = arith.constant 3.200000e+01 : f32
    %207 = vector.broadcast %cst_80 : f32 to vector<8x1xf32>
    %208 = arith.divf %206, %207 : vector<8x1xf32>
    %cst_81 = arith.constant 9.99999974E-6 : f32
    %209 = vector.broadcast %cst_81 : f32 to vector<8x1xf32>
    %210 = arith.addf %208, %209 : vector<8x1xf32>
    %211 = math.rsqrt %210 : vector<8x1xf32>
    %212 = vector.broadcast %211 : vector<8x1xf32> to vector<8x32xf32>
    %213 = arith.mulf %203, %212 : vector<8x32xf32>
    %214 = vector.broadcast %196 : vector<1x32xf32> to vector<8x32xf32>
    %215 = arith.mulf %213, %214 : vector<8x32xf32>
    %216 = vector.broadcast %197 : vector<1x32xf32> to vector<8x32xf32>
    %217 = arith.addf %215, %216 : vector<8x32xf32>
    %218 = arith.truncf %217 : vector<8x32xf32> to vector<8x32xbf16>
    %c0_82 = arith.constant 0 : index
    %c0_83 = arith.constant 0 : index
    %219 = vector.load %arg15[%c0_82, %c0_83] : memref<32x64xbf16, #tpu.memory_space<vmem>>, vector<32x64xbf16>
    %cst_84 = arith.constant dense<0.000000e+00> : vector<8x64xf32>
    %220 = tpu.matmul %218, %219, %cst_84 {dimension_numbers = #tpu.dot_dimension_numbers<[1], [0], [0], [1], [0, 0, 1, 1], [], []>} : vector<8x32xbf16>, vector<32x64xbf16>, vector<8x64xf32> -> vector<8x64xf32>
    %c0_85 = arith.constant 0 : index
    %c0_86 = arith.constant 0 : index
    %221 = vector.load %arg16[%c0_85, %c0_86] : memref<1x64xf32, #tpu.memory_space<vmem>>, vector<1x64xf32>
    %222 = vector.broadcast %221 : vector<1x64xf32> to vector<8x64xf32>
    %223 = arith.addf %220, %222 : vector<8x64xf32>
    %cst_87 = arith.constant 1.702000e+00 : f32
    %224 = vector.broadcast %cst_87 : f32 to vector<8x64xf32>
    %225 = arith.mulf %224, %223 : vector<8x64xf32>
    %226 = arith.negf %225 : vector<8x64xf32>
    %227 = math.exp %226 : vector<8x64xf32>
    %cst_88 = arith.constant 1.000000e+00 : f32
    %228 = vector.broadcast %cst_88 : f32 to vector<8x64xf32>
    %229 = arith.addf %228, %227 : vector<8x64xf32>
    %230 = arith.divf %228, %229 : vector<8x64xf32>
    %231 = arith.mulf %223, %230 : vector<8x64xf32>
    %232 = arith.truncf %231 : vector<8x64xf32> to vector<8x64xbf16>
    %c0_89 = arith.constant 0 : index
    %c0_90 = arith.constant 0 : index
    %233 = vector.load %arg17[%c0_89, %c0_90] : memref<64x32xbf16, #tpu.memory_space<vmem>>, vector<64x32xbf16>
    %cst_91 = arith.constant dense<0.000000e+00> : vector<8x32xf32>
    %234 = tpu.matmul %232, %233, %cst_91 {dimension_numbers = #tpu.dot_dimension_numbers<[1], [0], [0], [1], [0, 0, 1, 1], [], []>} : vector<8x64xbf16>, vector<64x32xbf16>, vector<8x32xf32> -> vector<8x32xf32>
    %c0_92 = arith.constant 0 : index
    %c0_93 = arith.constant 0 : index
    %235 = vector.load %arg18[%c0_92, %c0_93] : memref<1x32xf32, #tpu.memory_space<vmem>>, vector<1x32xf32>
    %236 = vector.broadcast %235 : vector<1x32xf32> to vector<8x32xf32>
    %237 = arith.addf %234, %236 : vector<8x32xf32>
    %238 = arith.addf %195, %237 : vector<8x32xf32>
    %c0_94 = arith.constant 0 : index
    %c0_95 = arith.constant 0 : index
    %c0_96 = arith.constant 0 : index
    %239 = vector.load %arg19[%c0_94, %c0_95, %c0_96] : memref<1x8x32xf32, #tpu.memory_space<vmem>>, vector<1x8x32xf32>
    %240 = vector.shape_cast %239 : vector<1x8x32xf32> to vector<8x32xf32>
    %241 = vector.shape_cast %238 : vector<8x32xf32> to vector<1x8x32xf32>
    tpu.vector_store %arg19[%c0_94, %c0_95, %c0_96], %241 {strides = array<i32>} : memref<1x8x32xf32, #tpu.memory_space<vmem>>, vector<1x8x32xf32>,
    return
  }
  func.func @transform_0(%arg0: i32) -> (i32, i32, i32) {
    %c0_i32 = arith.constant 0 : i32
    %c0_i32_0 = arith.constant 0 : i32
    %c0_i32_1 = arith.constant 0 : i32
    return %arg0, %c0_i32, %c0_i32_0 : i32, i32, i32
  }
  func.func @transform_1(%arg0: i32) -> (i32, i32, i32) {
    %c0_i32 = arith.constant 0 : i32
    %c0_i32_0 = arith.constant 0 : i32
    %c0_i32_1 = arith.constant 0 : i32
    return %arg0, %c0_i32, %c0_i32_0 : i32, i32, i32
  }
  func.func @transform_2(%arg0: i32) -> (i32, i32) {
    %c0_i32 = arith.constant 0 : i32
    %c0_i32_0 = arith.constant 0 : i32
    %c0_i32_1 = arith.constant 0 : i32
    return %c0_i32, %c0_i32_0 : i32, i32
  }
  func.func @transform_3(%arg0: i32) -> (i32, i32) {
    %c0_i32 = arith.constant 0 : i32
    %c0_i32_0 = arith.constant 0 : i32
    %c0_i32_1 = arith.constant 0 : i32
    return %c0_i32, %c0_i32_0 : i32, i32
  }
  func.func @transform_4(%arg0: i32) -> (i32, i32) {
    %c0_i32 = arith.constant 0 : i32
    %c0_i32_0 = arith.constant 0 : i32
    %c0_i32_1 = arith.constant 0 : i32
    return %c0_i32, %c0_i32_0 : i32, i32
  }
  func.func @transform_5(%arg0: i32) -> (i32, i32) {
    %c0_i32 = arith.constant 0 : i32
    %c0_i32_0 = arith.constant 0 : i32
    %c0_i32_1 = arith.constant 0 : i32
    return %c0_i32, %c0_i32_0 : i32, i32
  }
  func.func @transform_6(%arg0: i32) -> (i32, i32) {
    %c0_i32 = arith.constant 0 : i32
    %c0_i32_0 = arith.constant 0 : i32
    %c0_i32_1 = arith.constant 0 : i32
    return %c0_i32, %c0_i32_0 : i32, i32
  }
  func.func @transform_7(%arg0: i32) -> (i32, i32) {
    %c0_i32 = arith.constant 0 : i32
    %c0_i32_0 = arith.constant 0 : i32
    %c0_i32_1 = arith.constant 0 : i32
    return %c0_i32, %c0_i32_0 : i32, i32
  }
  func.func @transform_8(%arg0: i32) -> (i32, i32) {
    %c0_i32 = arith.constant 0 : i32
    %c0_i32_0 = arith.constant 0 : i32
    %c0_i32_1 = arith.constant 0 : i32
    return %c0_i32, %c0_i32_0 : i32, i32
  }
  func.func @transform_9(%arg0: i32) -> (i32, i32) {
    %c0_i32 = arith.constant 0 : i32
    %c0_i32_0 = arith.constant 0 : i32
    %c0_i32_1 = arith.constant 0 : i32
    return %c0_i32, %c0_i32_0 : i32, i32
  }
  func.func @transform_10(%arg0: i32) -> (i32, i32) {
    %c0_i32 = arith.constant 0 : i32
    %c0_i32_0 = arith.constant 0 : i32
    %c0_i32_1 = arith.constant 0 : i32
    return %c0_i32, %c0_i32_0 : i32, i32
  }
  func.func @transform_11(%arg0: i32) -> (i32, i32) {
    %c0_i32 = arith.constant 0 : i32
    %c0_i32_0 = arith.constant 0 : i32
    %c0_i32_1 = arith.constant 0 : i32
    return %c0_i32, %c0_i32_0 : i32, i32
  }
  func.func @transform_12(%arg0: i32) -> (i32, i32) {
    %c0_i32 = arith.constant 0 : i32
    %c0_i32_0 = arith.constant 0 : i32
    %c0_i32_1 = arith.constant 0 : i32
    return %c0_i32, %c0_i32_0 : i32, i32
  }
  func.func @transform_13(%arg0: i32) -> (i32, i32) {
    %c0_i32 = arith.constant 0 : i32
    %c0_i32_0 = arith.constant 0 : i32
    %c0_i32_1 = arith.constant 0 : i32
    return %c0_i32, %c0_i32_0 : i32, i32
  }
  func.func @transform_14(%arg0: i32) -> (i32, i32) {
    %c0_i32 = arith.constant 0 : i32
    %c0_i32_0 = arith.constant 0 : i32
    %c0_i32_1 = arith.constant 0 : i32
    return %c0_i32, %c0_i32_0 : i32, i32
  }
  func.func @transform_15(%arg0: i32) -> (i32, i32) {
    %c0_i32 = arith.constant 0 : i32
    %c0_i32_0 = arith.constant 0 : i32
    %c0_i32_1 = arith.constant 0 : i32
    return %c0_i32, %c0_i32_0 : i32, i32
  }
  func.func @transform_16(%arg0: i32) -> (i32, i32) {
    %c0_i32 = arith.constant 0 : i32
    %c0_i32_0 = arith.constant 0 : i32
    %c0_i32_1 = arith.constant 0 : i32
    return %c0_i32, %c0_i32_0 : i32, i32
  }
  func.func @transform_17(%arg0: i32) -> (i32, i32) {
    %c0_i32 = arith.constant 0 : i32
    %c0_i32_0 = arith.constant 0 : i32
    %c0_i32_1 = arith.constant 0 : i32
    return %c0_i32, %c0_i32_0 : i32, i32
  }
  func.func @transform_18(%arg0: i32) -> (i32, i32, i32) {
    %c0_i32 = arith.constant 0 : i32
    %c0_i32_0 = arith.constant 0 : i32
    %c0_i32_1 = arith.constant 0 : i32
    return %arg0, %c0_i32, %c0_i32_0 : i32, i32, i32
  }
}

</mosaic_0001>

<bundles_post_ra>
// kernel: tpu_custom_call.1
= control target key start
LH: loop header
LB: loop body
LE: loop exit
PB: predicated region body
PF: predicated region fallthrough
CT: control target
= control target key end

     0   :  { %s4177_s0 = inlined_call_operand.hbm [shape: f32[2,8,32], index: 0, kind: input, shape index: {}]   ;;  %s4178_s1 = inlined_call_operand.hbm [shape: f32[2,4,16], index: 1, kind: input, shape index: {}]   ;;  %s4179_s2 = inlined_call_operand.hbm [shape: f32[1,16], index: 2, kind: input, shape index: {}]   ;;  %s4180_s3 = inlined_call_operand.hbm [shape: f32[1,16], index: 3, kind: input, shape index: {}]   ;;  %s4181_s4 = inlined_call_operand.hbm [shape: bf16[16,32], index: 4, kind: input, shape index: {}]   ;;  %s4182_s5 = inlined_call_operand.hbm [shape: bf16[32,32], index: 5, kind: input, shape index: {}]   ;;  %s4183_s6 = inlined_call_operand.hbm [shape: f32[1,32], index: 6, kind: input, shape index: {}]   ;;  %s4184_s7 = inlined_call_operand.hbm [shape: f32[1,32], index: 7, kind: input, shape index: {}]   ;;  %s4185_s8 = inlined_call_operand.hbm [shape: bf16[32,96], index: 8, kind: input, shape index: {}]   ;;  %s4186_s9 = inlined_call_operand.hbm [shape: f32[1,96], index: 9, kind: input, shape index: {}]   ;;  %s4187_s10 = inlined_call_operand.hbm [shape: bf16[32,32], index: 10, kind: input, shape index: {}]   ;;  %s4188_s11 = inlined_call_operand.hbm [shape: f32[1,32], index: 11, kind: input, shape index: {}]   ;;  %s4189_s12 = inlined_call_operand.hbm [shape: f32[1,32], index: 12, kind: input, shape index: {}]   ;;  %s4190_s13 = inlined_call_operand.hbm [shape: f32[1,32], index: 13, kind: input, shape index: {}]   ;;  %s4191_s14 = inlined_call_operand.hbm [shape: bf16[32,64], index: 14, kind: input, shape index: {}]   ;;  %s4192_s15 = inlined_call_operand.hbm [shape: f32[1,64], index: 15, kind: input, shape index: {}]   ;;  %s4193_s16 = inlined_call_operand.hbm [shape: bf16[64,32], index: 16, kind: input, shape index: {}]   ;;  %s4194_s17 = inlined_call_operand.hbm [shape: f32[1,32], index: 17, kind: input, shape index: {}]   ;;  %s4195_s18 = inlined_call_operand.hbm [shape: f32[2,8,32], index: 18, kind: output, shape index: {}]  }
   0x1   :  { %4215 = sst [smem:[#allocation50_spill]] %s4177_s0 }
   0x2   :  { %4216 = sst [smem:[#allocation51_spill]] %s4178_s1 }
   0x3   :  { %4217 = sst [smem:[#allocation52_spill]] %s4179_s2 }
   0x4   :  { %4218 = sst [smem:[#allocation53_spill]] %s4180_s3 }
   0x5   :  { %4219 = sst [smem:[#allocation54_spill]] %s4181_s4 }
   0x6   :  { %4220 = sst [smem:[#allocation55_spill]] %s4182_s5 }
   0x7   :  { %4221 = sst [smem:[#allocation56_spill]] %s4183_s6 }
   0x8   :  { %4222 = sst [smem:[#allocation57_spill]] %s4184_s7 }
   0x9   :  { %4223 = sst [smem:[#allocation58_spill]] %s4185_s8 }
   0xa   :  { %4224 = sst [smem:[#allocation59_spill]] %s4186_s9 }
   0xb   :  { %4225 = sst [smem:[#allocation60_spill]] %s4194_s17 }
   0xc   :  { %4226 = sst [smem:[#allocation61_spill]] %s4195_s18 }
   0xd   :  { %23 = vsyncpa [#allocation3], 0 }
   0xe   :  { %25 = vsyncpa [#allocation3 + $0x1], 0 }
   0xf   :  { %26 = vsyncpa [#allocation6], 0 }
  0x10   :  { %28 = vsyncpa [#allocation6 + $0x1], 0 }
  0x11   :  { %29 = vsyncpa [#allocation9], 0 }
  0x12   :  { %30 = vsyncpa [#allocation12], 0 }
  0x13   :  { %31 = vsyncpa [#allocation15], 0 }
  0x14   :  { %32 = vsyncpa [#allocation18], 0 }
  0x15   :  { %33 = vsyncpa [#allocation21], 0 }
  0x16   :  { %34 = vsyncpa [#allocation24], 0 }
  0x17   :  { %35 = vsyncpa [#allocation27], 0 }
  0x18   :  { %36 = vsyncpa [#allocation30], 0 }
  0x19   :  { %37 = vsyncpa [#allocation4], 0 }
  0x1a   :  { %39 = vsyncpa [#allocation4 + $0x1], 0  ;;  %s3464_s27 = smov 0   ;;  %s3466_s28 = smov 0  }
  0x1b   :  { %s3468_s29 = smov 0   ;;  %s3470_s30 = smov 0  }
  0x1c LB: > { %4227 = sst [smem:[#allocation44_spill]] %s3321_s27  ;;  %s3335_s0 = smov [#allocation7]   ;;  %s3333_s30 = sphi %s3470_s30, %s4293_s30   ;;  %s3329_s29 = sphi %s3468_s29, %s4292_s29   ;;  %s3325_s28 = sphi %s3466_s28, %s4291_s28   ;;  %s3321_s27 = sphi %s3464_s27, %s4290_s27  }
  0x1d   : > { %4228 = sst [smem:[#allocation45_spill]] %s3325_s28  ;;  %s477_s19 = sshll.u32 %s3335_s0, 4  ;;  %s3490_s19 = int_to_ptr.vmem [resolvable:$true] %s477_s19 }
  0x1e   : > { %4229 = sst [smem:[#allocation46_spill]] %s3329_s29  ;;  %s3485_s1 = sadd.s32 4294967295, %s3333_s30  }
  0x1f   : > { %4230 = sst [smem:[#allocation47_spill]] %s3333_s30  ;;  %p2212_p0 = scmp.ge.s32.totalorder %s3333_s30, 1 }
  0x20   : > { %4231 = sst [smem:[#allocation48_spill]] %s3485_s1  ;;  %p4210_p1 = scmp.eq.s32.totalorder %s3485_s1, 0 }
  0x21   : > { %p464_p2 = scmp.lt.s32.totalorder %s3333_s30, 3  ;;  %s3336_s21 = smov [#allocation8]  }
  0x22   : > { %s488_s22 = sshll.u32 %s3336_s21, 4  ;;  %s3337_s23 = smov [#allocation11]   ;;  %s3499_s22 = int_to_ptr.vmem [resolvable:$true] %s488_s22 }
  0x23   : > { %p3492_p3 = pnand %p2212_p0, %p464_p2  ;;  %s511_s24 = sshll.u32 %s3337_s23, 4  ;;  %s3507_s24 = int_to_ptr.vmem [resolvable:$true] %s511_s24 }
  0x24   : > { %s4235_s0 = sld [smem:[#allocation52_spill]] }
  0x25   : > { %s4232_s20 = scalar_select %p3492_p3, 1, 0 }
  0x26   : > { %p2521_p5 = pneg %p3492_p3 }
  0x27   : > { %4233 = sst [smem:[#allocation49_spill]] %s4232_s20 }
  0x28   : > { %p3503_p6 = pnand %p2521_p5, %p4210_p1 }
  0x2a   : > { %s2719_s18 = scalar_lea.hbm %s4235_s0, 16  ;;  %p3517_p8 = pneg %p3503_p6 }
  0x2b   : > { %p2720_p7 = scmp.ne.s32.totalorder %s4235_s0, %s2719_s18  ;;  %p2726_p11 = scmp.lt.u32.totalorder %s2719_s18, %s4235_s0 }
  0x2d   : > { %p2722_p9 = pnand %p3517_p8, %p2720_p7 }
  0x2f   : > { %p2723_p10 = pneg %p2722_p9 }
  0x31   : > { %p2728_p12 = pnand %p2726_p11, %p2723_p10 }
  0x33   : > { %2731 = shalt.err (!%p2728_p12)
}
  0x34   : > { %s2732_s27 = scalar_lea.vmem %s3490_s19, 16  ;;  %s2739_s20 = scalar_lea.vmem %s3490_s19, 32 }
  0x35   : > { %p2733_p13 = scmp.ne.s32.totalorder %s3490_s19, %s2732_s27  ;;  %p2740_p5 = scmp.lt.s32.totalorder %s3490_s19, %s3490_s19 }
  0x36   : > { %p2741_p7 = scmp.lt.s32.totalorder %s2739_s20, %s2732_s27 }
  0x37   : > { %p2735_p0 = pnand %p2733_p13, %p3517_p8 }
  0x38   : > { %p2742_p9 = por %p2741_p7, %p2740_p5 }
  0x39   : > { %p2736_p2 = pneg %p2735_p0 }
  0x3b   : > { %p2743_p4 = pnand %p2742_p9, %p2736_p2 }
  0x3d   : > { %2746 = shalt.err (!%p2743_p4)
}
  0x3e   : > { %2524 = dma.hbm_to_vmem [thread:$0]  (!%p3503_p6), %s4235_s0, 16, %s3490_s19, [#allocation6]  }
  0x3f   : > { %s4237_s3 = sld [smem:[#allocation53_spill]] }
  0x45   : > { %s2747_s23 = scalar_lea.hbm %s4237_s3, 16 }
  0x46   : > { %p2748_p10 = scmp.ne.s32.totalorder %s4237_s3, %s2747_s23  ;;  %p2754_p4 = scmp.lt.u32.totalorder %s2747_s23, %s4237_s3 }
  0x48   : > { %p2750_p11 = pnand %p2748_p10, %p3517_p8 }
  0x4a   : > { %p2751_p12 = pneg %p2750_p11 }
  0x4c   : > { %p2756_p13 = pnand %p2754_p4, %p2751_p12 }
  0x4e   : > { %2759 = shalt.err (!%p2756_p13)
}
  0x4f   : > { %s2760_s19 = scalar_lea.vmem %s3499_s22, 16  ;;  %s2767_s28 = scalar_lea.vmem %s3499_s22, 32 }
  0x50   : > { %p2761_p0 = scmp.ne.s32.totalorder %s3499_s22, %s2760_s19  ;;  %p2768_p7 = scmp.lt.s32.totalorder %s3499_s22, %s3499_s22 }
  0x51   : > { %p2769_p9 = scmp.lt.s32.totalorder %s2767_s28, %s2760_s19 }
  0x52   : > { %p2763_p2 = pnand %p2761_p0, %p3517_p8 }
  0x53   : > { %p2770_p10 = por %p2769_p9, %p2768_p7 }
  0x54   : > { %p2764_p5 = pneg %p2763_p2 }
  0x56   : > { %p2771_p11 = pnand %p2770_p10, %p2764_p5 }
  0x58   : > { %2774 = shalt.err (!%p2771_p11)
}
  0x59   : > { %2527 = dma.hbm_to_vmem [thread:$0]  (!%p3503_p6), %s4237_s3, 16, %s3499_s22, [#allocation9]  }
  0x5a   : > { %s4238_s5 = sld [smem:[#allocation55_spill]] }
  0x60   : > { %s2775_s26 = scalar_lea.hbm %s4238_s5, 256 }
  0x61   : > { %p2776_p12 = scmp.ne.s32.totalorder %s4238_s5, %s2775_s26  ;;  %p2782_p0 = scmp.lt.u32.totalorder %s2775_s26, %s4238_s5 }
  0x63   : > { %p2778_p4 = pnand %p2776_p12, %p3517_p8 }
  0x65   : > { %p2779_p13 = pneg %p2778_p4 }
  0x67   : > { %p2784_p2 = pnand %p2782_p0, %p2779_p13 }
  0x69   : > { %2787 = shalt.err (!%p2784_p2)
}
  0x6a   : > { %s2788_s22 = scalar_lea.vmem %s3507_s24, 256  ;;  %p2796_p10 = scmp.lt.s32.totalorder %s3507_s24, %s3507_s24 }
  0x6b   : > { %p2789_p5 = scmp.ne.s32.totalorder %s3507_s24, %s2788_s22  ;;  %p2797_p11 = scmp.lt.s32.totalorder %s2788_s22, %s2788_s22 }
  0x6d   : > { %p2791_p7 = pnand %p2789_p5, %p3517_p8  ;;  %p2798_p12 = por %p2797_p11, %p2796_p10 }
  0x6f   : > { %p2792_p9 = pneg %p2791_p7 }
  0x71   : > { %p2799_p4 = pnand %p2798_p12, %p2792_p9 }
  0x73   : > { %2802 = shalt.err (!%p2799_p4)
}
  0x74   : > { %s3338_s28 = smov 64   ;;  %s3339_s29 = smov 4  }
  0x75   : > { %2533 = dma.hbm_to_vmem [thread:$0]  (!%p3503_p6), %s4238_s5, 256, %s3507_s24, [#allocation12], %s3338_s28, %s3338_s28, %s3339_s29  }
  0x76   : > { %s3340_s25 = smov [#allocation14]   ;;  %s3341_s23 = smov [#allocation17]  }
  0x77   : > { %s536_s26 = sshll.u32 %s3340_s25, 4  ;;  %s560_s27 = sshll.u32 %s3341_s23, 4  ;;  %s537_s26 = int_to_ptr.vmem [resolvable:$true] %s536_s26  ;;  %s561_s27 = int_to_ptr.vmem [resolvable:$true] %s560_s27 }
  0x78   : > { %s4239_s7 = sld [smem:[#allocation57_spill]] }
  0x7e   : > { %s2803_s22 = scalar_lea.hbm %s4239_s7, 16 }
  0x7f   : > { %p2804_p13 = scmp.ne.s32.totalorder %s4239_s7, %s2803_s22  ;;  %p2810_p5 = scmp.lt.u32.totalorder %s2803_s22, %s4239_s7 }
  0x81   : > { %p2806_p0 = pnand %p2804_p13, %p3517_p8 }
  0x83   : > { %p2807_p2 = pneg %p2806_p0 }
  0x85   : > { %p2812_p7 = pnand %p2810_p5, %p2807_p2 }
  0x87   : > { %2815 = shalt.err (!%p2812_p7)
}
  0x88   : > { %s2816_s24 = scalar_lea.vmem %s537_s26, 16  ;;  %s2823_s18 = scalar_lea.vmem %s537_s26, 32 }
  0x89   : > { %p2817_p9 = scmp.ne.s32.totalorder %s537_s26, %s2816_s24  ;;  %p2824_p12 = scmp.lt.s32.totalorder %s537_s26, %s537_s26 }
  0x8a   : > { %p2825_p4 = scmp.lt.s32.totalorder %s2823_s18, %s2816_s24 }
  0x8b   : > { %p2819_p10 = pnand %p2817_p9, %p3517_p8 }
  0x8c   : > { %p2826_p1 = por %p2825_p4, %p2824_p12 }
  0x8d   : > { %p2820_p11 = pneg %p2819_p10 }
  0x8f   : > { %p2827_p3 = pnand %p2826_p1, %p2820_p11 }
  0x91   : > { %2830 = shalt.err (!%p2827_p3)
}
  0x92   : > { %2539 = dma.hbm_to_vmem [thread:$0]  (!%p3503_p6), %s4239_s7, 16, %s537_s26, [#allocation15]  }
  0x93   : > { %s4240_s9 = sld [smem:[#allocation59_spill]] }
  0x99   : > { %s2831_s1 = scalar_lea.hbm %s4240_s9, 16 }
  0x9a   : > { %p2832_p13 = scmp.ne.s32.totalorder %s4240_s9, %s2831_s1  ;;  %p2838_p3 = scmp.lt.u32.totalorder %s2831_s1, %s4240_s9 }
  0x9c   : > { %p2834_p0 = pnand %p2832_p13, %p3517_p8 }
  0x9e   : > { %p2835_p1 = pneg %p2834_p0 }
  0xa0   : > { %p2840_p2 = pnand %p2838_p3, %p2835_p1 }
  0xa2   : > { %2843 = shalt.err (!%p2840_p2)
}
  0xa3   : > { %s2844_s22 = scalar_lea.vmem %s561_s27, 16  ;;  %s2851_s26 = scalar_lea.vmem %s561_s27, 32 }
  0xa4   : > { %p2845_p5 = scmp.ne.s32.totalorder %s561_s27, %s2844_s22  ;;  %p2852_p10 = scmp.lt.s32.totalorder %s561_s27, %s561_s27 }
  0xa5   : > { %p2853_p11 = scmp.lt.s32.totalorder %s2851_s26, %s2844_s22 }
  0xa6   : > { %p2847_p7 = pnand %p2845_p5, %p3517_p8 }
  0xa7   : > { %p2854_p12 = por %p2853_p11, %p2852_p10 }
  0xa8   : > { %p2848_p9 = pneg %p2847_p7 }
  0xaa   : > { %p2855_p4 = pnand %p2854_p12, %p2848_p9 }
  0xac   : > { %2858 = shalt.err (!%p2855_p4)
}
  0xad   : > { %2545 = dma.hbm_to_vmem [thread:$0]  (!%p3503_p6), %s4240_s9, 16, %s561_s27, [#allocation18]  }
  0xae   : > { %s3342_s3 = smov [#allocation20]   ;;  %s3343_s17 = smov [#allocation23]  }
  0xaf   : > { %s584_s0 = sshll.u32 %s3342_s3, 4  ;;  %s606_s30 = sshll.u32 %s3343_s17, 4  ;;  %s585_s0 = int_to_ptr.vmem [resolvable:$true] %s584_s0  ;;  %s607_s30 = int_to_ptr.vmem [resolvable:$true] %s606_s30 }
  0xb0   : > { %s2859_s23 = scalar_lea.hbm %s4188_s11, 16 }
  0xb1   : > { %p2860_p13 = scmp.ne.s32.totalorder %s4188_s11, %s2859_s23  ;;  %p2866_p3 = scmp.lt.u32.totalorder %s2859_s23, %s4188_s11 }
  0xb3   : > { %p2862_p0 = pnand %p2860_p13, %p3517_p8 }
  0xb5   : > { %p2863_p1 = pneg %p2862_p0 }
  0xb7   : > { %p2868_p2 = pnand %p2866_p3, %p2863_p1 }
  0xb9   : > { %2871 = shalt.err (!%p2868_p2)
}
  0xba   : > { %s2872_s27 = scalar_lea.vmem %s585_s0, 16  ;;  %s2879_s24 = scalar_lea.vmem %s585_s0, 32 }
  0xbb   : > { %p2873_p5 = scmp.ne.s32.totalorder %s585_s0, %s2872_s27  ;;  %p2880_p10 = scmp.lt.s32.totalorder %s585_s0, %s585_s0 }
  0xbc   : > { %p2881_p11 = scmp.lt.s32.totalorder %s2879_s24, %s2872_s27 }
  0xbd   : > { %p2875_p7 = pnand %p2873_p5, %p3517_p8 }
  0xbe   : > { %p2882_p12 = por %p2881_p11, %p2880_p10 }
  0xbf   : > { %p2876_p9 = pneg %p2875_p7 }
  0xc1   : > { %p2883_p4 = pnand %p2882_p12, %p2876_p9 }
  0xc3   : > { %2886 = shalt.err (!%p2883_p4)
}
  0xc4   : > { %2551 = dma.hbm_to_vmem [thread:$0]  (!%p3503_p6), %s4188_s11, 16, %s585_s0, [#allocation21]  }
  0xc5   : > { %s2887_s25 = scalar_lea.hbm %s4190_s13, 16 }
  0xc6   : > { %p2888_p13 = scmp.ne.s32.totalorder %s4190_s13, %s2887_s25  ;;  %p2894_p3 = scmp.lt.u32.totalorder %s2887_s25, %s4190_s13 }
  0xc8   : > { %p2890_p0 = pnand %p2888_p13, %p3517_p8 }
  0xca   : > { %p2891_p1 = pneg %p2890_p0 }
  0xcc   : > { %p2896_p2 = pnand %p2894_p3, %p2891_p1 }
  0xce   : > { %2899 = shalt.err (!%p2896_p2)
}
  0xcf   : > { %s2900_s26 = scalar_lea.vmem %s607_s30, 16  ;;  %s2907_s0 = scalar_lea.vmem %s607_s30, 32 }
  0xd0   : > { %p2901_p5 = scmp.ne.s32.totalorder %s607_s30, %s2900_s26  ;;  %p2908_p10 = scmp.lt.s32.totalorder %s607_s30, %s607_s30 }
  0xd1   : > { %p2909_p11 = scmp.lt.s32.totalorder %s2907_s0, %s2900_s26 }
  0xd2   : > { %p2903_p7 = pnand %p2901_p5, %p3517_p8 }
  0xd3   : > { %p2910_p12 = por %p2909_p11, %p2908_p10 }
  0xd4   : > { %p2904_p9 = pneg %p2903_p7 }
  0xd6   : > { %p2911_p4 = pnand %p2910_p12, %p2904_p9 }
  0xd8   : > { %2914 = shalt.err (!%p2911_p4)
}
  0xd9   : > { %2557 = dma.hbm_to_vmem [thread:$0]  (!%p3503_p6), %s4190_s13, 16, %s607_s30, [#allocation24]  }
  0xda   : > { %s3344_s18 = smov [#allocation26]   ;;  %s3345_s17 = smov [#allocation10]  }
  0xdb   : > { %s630_s3 = sshll.u32 %s3344_s18, 4  ;;  %s498_s1 = sshll.u32 %s3345_s17, 4  ;;  %s631_s3 = int_to_ptr.vmem [resolvable:$true] %s630_s3  ;;  %s499_s1 = int_to_ptr.vmem [resolvable:$true] %s498_s1 }
  0xdc   : > { %s2915_s20 = scalar_lea.hbm %s4192_s15, 16 }
  0xdd   : > { %p2916_p13 = scmp.ne.s32.totalorder %s4192_s15, %s2915_s20  ;;  %p2922_p3 = scmp.lt.u32.totalorder %s2915_s20, %s4192_s15 }
  0xdf   : > { %p2918_p0 = pnand %p2916_p13, %p3517_p8 }
  0xe1   : > { %p2919_p1 = pneg %p2918_p0 }
  0xe3   : > { %p2924_p2 = pnand %p2922_p3, %p2919_p1 }
  0xe5   : > { %2927 = shalt.err (!%p2924_p2)
}
  0xe6   : > { %s2928_s30 = scalar_lea.vmem %s631_s3, 16  ;;  %s2935_s27 = scalar_lea.vmem %s631_s3, 32 }
  0xe7   : > { %p2929_p5 = scmp.ne.s32.totalorder %s631_s3, %s2928_s30  ;;  %p2936_p10 = scmp.lt.s32.totalorder %s631_s3, %s631_s3 }
  0xe8   : > { %p2937_p11 = scmp.lt.s32.totalorder %s2935_s27, %s2928_s30 }
  0xe9   : > { %p2931_p7 = pnand %p2929_p5, %p3517_p8 }
  0xea   : > { %p2938_p12 = por %p2937_p11, %p2936_p10 }
  0xeb   : > { %p2932_p9 = pneg %p2931_p7 }
  0xed   : > { %p2939_p4 = pnand %p2938_p12, %p2932_p9 }
  0xef   : > { %2942 = shalt.err (!%p2939_p4)
}
  0xf0   : > { %2563 = dma.hbm_to_vmem [thread:$0]  (!%p3503_p6), %s4192_s15, 16, %s631_s3, [#allocation27]  }
  0xf1   : > { %s4241_s4 = sld [smem:[#allocation54_spill]] }
  0xf7   : > { %s2943_s23 = scalar_lea.hbm %s4241_s4, 128 }
  0xf8   : > { %p2944_p13 = scmp.ne.s32.totalorder %s4241_s4, %s2943_s23  ;;  %p2950_p3 = scmp.lt.u32.totalorder %s2943_s23, %s4241_s4 }
  0xfa   : > { %p2946_p0 = pnand %p2944_p13, %p3517_p8 }
  0xfc   : > { %p2947_p1 = pneg %p2946_p0 }
  0xfe   : > { %p2952_p2 = pnand %p2950_p3, %p2947_p1 }
 0x100   : > { %2955 = shalt.err (!%p2952_p2)
}
 0x101   : > { %s2956_s0 = scalar_lea.vmem %s499_s1, 128  ;;  %p2964_p10 = scmp.lt.s32.totalorder %s499_s1, %s499_s1 }
 0x102   : > { %p2957_p5 = scmp.ne.s32.totalorder %s499_s1, %s2956_s0  ;;  %p2965_p11 = scmp.lt.s32.totalorder %s2956_s0, %s2956_s0 }
 0x104   : > { %p2959_p7 = pnand %p2957_p5, %p3517_p8  ;;  %p2966_p12 = por %p2965_p11, %p2964_p10 }
 0x106   : > { %p2960_p9 = pneg %p2959_p7 }
 0x108   : > { %p2967_p4 = pnand %p2966_p12, %p2960_p9 }
 0x10a   : > { %2970 = shalt.err (!%p2967_p4)
}
 0x10b   : > { %2530 = dma.hbm_to_vmem [thread:$0]  (!%p3503_p6), %s4241_s4, 128, %s499_s1, [#allocation9], %s3338_s28, %s3338_s28, %s3339_s29  }
 0x10c   : > { %s3346_s27 = smov [#allocation13]   ;;  %s3347_s18 = smov [#allocation16]  }
 0x10d   : > { %s525_s24 = sshll.u32 %s3346_s27, 4  ;;  %s546_s17 = sshll.u32 %s3347_s18, 4  ;;  %s526_s24 = int_to_ptr.vmem [resolvable:$true] %s525_s24  ;;  %s547_s17 = int_to_ptr.vmem [resolvable:$true] %s546_s17 }
 0x10e   : > { %s4242_s6 = sld [smem:[#allocation56_spill]] }
 0x114   : > { %s2971_s20 = scalar_lea.hbm %s4242_s6, 16 }
 0x115   : > { %p2972_p13 = scmp.ne.s32.totalorder %s4242_s6, %s2971_s20  ;;  %p2978_p3 = scmp.lt.u32.totalorder %s2971_s20, %s4242_s6 }
 0x117   : > { %p2974_p0 = pnand %p2972_p13, %p3517_p8 }
 0x119   : > { %p2975_p1 = pneg %p2974_p0 }
 0x11b   : > { %p2980_p2 = pnand %p2978_p3, %p2975_p1 }
 0x11d   : > { %2983 = shalt.err (!%p2980_p2)
}
 0x11e   : > { %s2984_s1 = scalar_lea.vmem %s526_s24, 16  ;;  %s2991_s3 = scalar_lea.vmem %s526_s24, 32 }
 0x11f   : > { %p2985_p5 = scmp.ne.s32.totalorder %s526_s24, %s2984_s1  ;;  %p2992_p10 = scmp.lt.s32.totalorder %s526_s24, %s526_s24 }
 0x120   : > { %p2993_p11 = scmp.lt.s32.totalorder %s2991_s3, %s2984_s1 }
 0x121   : > { %p2987_p7 = pnand %p2985_p5, %p3517_p8 }
 0x122   : > { %p2994_p12 = por %p2993_p11, %p2992_p10 }
 0x123   : > { %p2988_p9 = pneg %p2987_p7 }
 0x125   : > { %p2995_p4 = pnand %p2994_p12, %p2988_p9 }
 0x127   : > { %2998 = shalt.err (!%p2995_p4)
}
 0x128   : > { %2536 = dma.hbm_to_vmem [thread:$0]  (!%p3503_p6), %s4242_s6, 16, %s526_s24, [#allocation12]  }
 0x129   : > { %s4243_s8 = sld [smem:[#allocation58_spill]] }
 0x12f   : > { %s2999_s23 = scalar_lea.hbm %s4243_s8, 256 }
 0x130   : > { %p3000_p13 = scmp.ne.s32.totalorder %s4243_s8, %s2999_s23  ;;  %p3006_p3 = scmp.lt.u32.totalorder %s2999_s23, %s4243_s8 }
 0x132   : > { %p3002_p0 = pnand %p3000_p13, %p3517_p8 }
 0x134   : > { %p3003_p1 = pneg %p3002_p0 }
 0x136   : > { %p3008_p2 = pnand %p3006_p3, %p3003_p1 }
 0x138   : > { %3011 = shalt.err (!%p3008_p2)
}
 0x139   : > { %s3012_s0 = scalar_lea.vmem %s547_s17, 256  ;;  %p3020_p10 = scmp.lt.s32.totalorder %s547_s17, %s547_s17 }
 0x13a   : > { %p3013_p5 = scmp.ne.s32.totalorder %s547_s17, %s3012_s0  ;;  %p3021_p11 = scmp.lt.s32.totalorder %s3012_s0, %s3012_s0 }
 0x13c   : > { %p3015_p7 = pnand %p3013_p5, %p3517_p8  ;;  %p3022_p12 = por %p3021_p11, %p3020_p10 }
 0x13e   : > { %p3016_p9 = pneg %p3015_p7 }
 0x140   : > { %p3023_p4 = pnand %p3022_p12, %p3016_p9 }
 0x142   : > { %3026 = shalt.err (!%p3023_p4)
}
 0x143   : > { %2542 = dma.hbm_to_vmem [thread:$0]  (!%p3503_p6), %s4243_s8, 256, %s547_s17, [#allocation15], %s3338_s28, %s3338_s28, %s3339_s29  }
 0x144   : > { %s3348_s3 = smov [#allocation19]   ;;  %s3349_s27 = smov [#allocation22]  }
 0x145   : > { %s570_s30 = sshll.u32 %s3348_s3, 4  ;;  %s595_s18 = sshll.u32 %s3349_s27, 4  ;;  %s571_s30 = int_to_ptr.vmem [resolvable:$true] %s570_s30  ;;  %s596_s18 = int_to_ptr.vmem [resolvable:$true] %s595_s18 }
 0x146   : > { %s3027_s20 = scalar_lea.hbm %s4187_s10, 256 }
 0x147   : > { %p3028_p13 = scmp.ne.s32.totalorder %s4187_s10, %s3027_s20  ;;  %p3034_p3 = scmp.lt.u32.totalorder %s3027_s20, %s4187_s10 }
 0x149   : > { %p3030_p0 = pnand %p3028_p13, %p3517_p8 }
 0x14b   : > { %p3031_p1 = pneg %p3030_p0 }
 0x14d   : > { %p3036_p2 = pnand %p3034_p3, %p3031_p1 }
 0x14f   : > { %3039 = shalt.err (!%p3036_p2)
}
 0x150   : > { %s3040_s17 = scalar_lea.vmem %s571_s30, 256  ;;  %p3048_p10 = scmp.lt.s32.totalorder %s571_s30, %s571_s30 }
 0x151   : > { %p3041_p5 = scmp.ne.s32.totalorder %s571_s30, %s3040_s17  ;;  %p3049_p11 = scmp.lt.s32.totalorder %s3040_s17, %s3040_s17 }
 0x153   : > { %p3043_p7 = pnand %p3041_p5, %p3517_p8  ;;  %p3050_p12 = por %p3049_p11, %p3048_p10 }
 0x155   : > { %p3044_p9 = pneg %p3043_p7 }
 0x157   : > { %p3051_p4 = pnand %p3050_p12, %p3044_p9 }
 0x159   : > { %3054 = shalt.err (!%p3051_p4)
}
 0x15a   : > { %2548 = dma.hbm_to_vmem [thread:$0]  (!%p3503_p6), %s4187_s10, 256, %s571_s30, [#allocation18], %s3338_s28, %s3338_s28, %s3339_s29  }
 0x15b   : > { %s3055_s25 = scalar_lea.hbm %s4189_s12, 16 }
 0x15c   : > { %p3056_p13 = scmp.ne.s32.totalorder %s4189_s12, %s3055_s25  ;;  %p3062_p3 = scmp.lt.u32.totalorder %s3055_s25, %s4189_s12 }
 0x15e   : > { %p3058_p0 = pnand %p3056_p13, %p3517_p8 }
 0x160   : > { %p3059_p1 = pneg %p3058_p0 }
 0x162   : > { %p3064_p2 = pnand %p3062_p3, %p3059_p1 }
 0x164   : > { %3067 = shalt.err (!%p3064_p2)
}
 0x165   : > { %s3068_s26 = scalar_lea.vmem %s596_s18, 16  ;;  %s3075_s30 = scalar_lea.vmem %s596_s18, 32 }
 0x166   : > { %p3069_p5 = scmp.ne.s32.totalorder %s596_s18, %s3068_s26  ;;  %p3076_p10 = scmp.lt.s32.totalorder %s596_s18, %s596_s18 }
 0x167   : > { %p3077_p11 = scmp.lt.s32.totalorder %s3075_s30, %s3068_s26 }
 0x168   : > { %p3071_p7 = pnand %p3069_p5, %p3517_p8 }
 0x169   : > { %p3078_p12 = por %p3077_p11, %p3076_p10 }
 0x16a   : > { %p3072_p9 = pneg %p3071_p7 }
 0x16c   : > { %p3079_p4 = pnand %p3078_p12, %p3072_p9 }
 0x16e   : > { %3082 = shalt.err (!%p3079_p4)
}
 0x16f   : > { %2554 = dma.hbm_to_vmem [thread:$0]  (!%p3503_p6), %s4189_s12, 16, %s596_s18, [#allocation21]  }
 0x170   : > { %s3350_s24 = smov [#allocation25]   ;;  %s3351_s3 = smov [#allocation28]  }
 0x171   : > { %s616_s1 = sshll.u32 %s3350_s24, 4  ;;  %s640_s27 = sshll.u32 %s3351_s3, 4  ;;  %s617_s1 = int_to_ptr.vmem [resolvable:$true] %s616_s1  ;;  %s641_s27 = int_to_ptr.vmem [resolvable:$true] %s640_s27 }
 0x172   : > { %s3083_s20 = scalar_lea.hbm %s4191_s14, 256 }
 0x173   : > { %p3084_p13 = scmp.ne.s32.totalorder %s4191_s14, %s3083_s20  ;;  %p3090_p3 = scmp.lt.u32.totalorder %s3083_s20, %s4191_s14 }
 0x175   : > { %p3086_p0 = pnand %p3084_p13, %p3517_p8 }
 0x177   : > { %p3087_p1 = pneg %p3086_p0 }
 0x179   : > { %p3092_p2 = pnand %p3090_p3, %p3087_p1 }
 0x17b   : > { %3095 = shalt.err (!%p3092_p2)
}
 0x17c   : > { %s3096_s18 = scalar_lea.vmem %s617_s1, 256  ;;  %p3104_p10 = scmp.lt.s32.totalorder %s617_s1, %s617_s1 }
 0x17d   : > { %p3097_p5 = scmp.ne.s32.totalorder %s617_s1, %s3096_s18  ;;  %p3105_p11 = scmp.lt.s32.totalorder %s3096_s18, %s3096_s18 }
 0x17f   : > { %p3099_p7 = pnand %p3097_p5, %p3517_p8  ;;  %p3106_p12 = por %p3105_p11, %p3104_p10 }
 0x181   : > { %p3100_p9 = pneg %p3099_p7 }
 0x183   : > { %p3107_p4 = pnand %p3106_p12, %p3100_p9 }
 0x185   : > { %3110 = shalt.err (!%p3107_p4)
}
 0x186   : > { %2560 = dma.hbm_to_vmem [thread:$0]  (!%p3503_p6), %s4191_s14, 256, %s617_s1, [#allocation24], %s3338_s28, %s3338_s28, %s3339_s29  }
 0x187   : > { %s3111_s25 = scalar_lea.hbm %s4193_s16, 512 }
 0x188   : > { %p3112_p13 = scmp.ne.s32.totalorder %s4193_s16, %s3111_s25  ;;  %p3118_p3 = scmp.lt.u32.totalorder %s3111_s25, %s4193_s16 }
 0x18a   : > { %p3114_p0 = pnand %p3112_p13, %p3517_p8 }
 0x18c   : > { %p3115_p1 = pneg %p3114_p0 }
 0x18e   : > { %p3120_p2 = pnand %p3118_p3, %p3115_p1 }
 0x190   : > { %3123 = shalt.err (!%p3120_p2)
}
 0x191   : > { %s3124_s26 = scalar_lea.vmem %s641_s27, 512  ;;  %p3132_p10 = scmp.lt.s32.totalorder %s641_s27, %s641_s27 }
 0x192   : > { %p3125_p5 = scmp.ne.s32.totalorder %s641_s27, %s3124_s26  ;;  %p3133_p11 = scmp.lt.s32.totalorder %s3124_s26, %s3124_s26 }
 0x194   : > { %p3127_p7 = pnand %p3125_p5, %p3517_p8  ;;  %p3134_p12 = por %p3133_p11, %p3132_p10 }
 0x196   : > { %p3128_p9 = pneg %p3127_p7 }
 0x198   : > { %p3135_p4 = pnand %p3134_p12, %p3128_p9 }
 0x19a   : > { %3138 = shalt.err (!%p3135_p4)
}
 0x19b   : > { %2566 = dma.hbm_to_vmem [thread:$0]  (!%p3503_p6), %s4193_s16, 512, %s641_s27, [#allocation27], %s3338_s28, %s3338_s28, %s3339_s29  }
 0x19c   : > { %s3352_s18 = smov [#allocation29]   ;;  %s4244_s3 = sld [smem:[#allocation60_spill]] }
 0x19d   : > { %s654_s0 = sshll.u32 %s3352_s18, 4  ;;  %s655_s0 = int_to_ptr.vmem [resolvable:$true] %s654_s0 }
 0x1a2   : > { %s3139_s25 = scalar_lea.hbm %s4244_s3, 16 }
 0x1a3   : > { %p3140_p13 = scmp.ne.s32.totalorder %s4244_s3, %s3139_s25  ;;  %p3146_p3 = scmp.lt.u32.totalorder %s3139_s25, %s4244_s3 }
 0x1a5   : > { %p3142_p0 = pnand %p3140_p13, %p3517_p8 }
 0x1a7   : > { %p3143_p1 = pneg %p3142_p0 }
 0x1a9   : > { %p3148_p2 = pnand %p3146_p3, %p3143_p1 }
 0x1ab   : > { %3151 = shalt.err (!%p3148_p2)
}
 0x1ac   : > { %s3152_s28 = scalar_lea.vmem %s655_s0, 16  ;;  %s3159_s29 = scalar_lea.vmem %s655_s0, 32 }
 0x1ad   : > { %p3153_p5 = scmp.ne.s32.totalorder %s655_s0, %s3152_s28  ;;  %p3160_p10 = scmp.lt.s32.totalorder %s655_s0, %s655_s0 }
 0x1ae   : > { %p3161_p11 = scmp.lt.s32.totalorder %s3159_s29, %s3152_s28 }
 0x1af   : > { %p3155_p7 = pnand %p3153_p5, %p3517_p8 }
 0x1b0   : > { %p3162_p12 = por %p3161_p11, %p3160_p10 }
 0x1b1   : > { %p3156_p9 = pneg %p3155_p7 }
 0x1b3   : > { %p3163_p4 = pnand %p3162_p12, %p3156_p9 }
 0x1b5   : > { %3166 = shalt.err (!%p3163_p4)
}
 0x1b6   : > { %s4245_s1 = sld [smem:[#allocation47_spill]]  ;;  %s4246_s30 = sld [smem:[#allocation46_spill]] }
 0x1b7   : > { %s4247_s18 = sld [smem:[#allocation45_spill]]  ;;  %s4248_s21 = sld [smem:[#allocation44_spill]] }
 0x1b8   : > { %s4249_s17 = sld [smem:[#allocation48_spill]] }
 0x1b9   : > { %2569 = dma.hbm_to_vmem [thread:$0]  (!%p3503_p6), %s4244_s3, 16, %s655_s0, [#allocation30]  }
 0x1bc   : > { %s2211_s24 = sadd.s32 4294967294, %s4245_s1   ;;  %s3840_s2 = sadd.s32 1, %s4245_s1  }
 0x1bd   : > { %s49_s25 = ssub.s32 %s4245_s1, %s3840_s2  ;;  %s52_s23 = sadd.s32 1, %s4246_s30 }
 0x1be   : > { %p50_p8 = scmp.eq.s32.totalorder %s49_s25, 0  ;;  %p59_p13 = scmp.ne.s32.totalorder %s4246_s30, %s4247_s18 }
 0x1bf   : > { %p60_p0 = scmp.eq.s32.totalorder %s4245_s1, 0  ;;  %p65_p1 = scmp.ne.s32.totalorder %s4247_s18, %s4248_s21 }
 0x1c0   : > { %s3851_s20 = scalar_select %p50_p8, %s4246_s30, %s52_s23  }
 0x1c1   : > { %p3853_p3 = por %p60_p0, %p59_p13  ;;  %p4251_p2 = scmp.eq.s32.totalorder %s4249_s17, 0 }
 0x1c2   : > { %p451_p5 = scmp.eq.s32.totalorder %s4249_s17, 1  ;;  %p457_p7 = scmp.eq.s32.totalorder %s2211_s24, 1 }
 0x1c3   : > { %p3859_p6 = por %p4251_p2, %p65_p1  ;;  %p2597_p9 = scmp.lt.s32.totalorder %s4245_s1, 2 }
 0x1c4   : > { %s3866_s22 = sand.u32 1, %s4246_s30   ;;  %p3868_p10 = por %p451_p5, %p59_p13 }
 0x1c5   : > { %s4252_s0 = scalar_select %p3859_p6, 1, 0 }
 0x1c6   : > { %s4253_s28 = scalar_select %p3868_p10, 1, 0 }
 0x1c7   : > { %p3872_p11 = por %p457_p7, %p65_p1  ;;  %s2230_s27 = sshll.u32 %s3866_s22, 3 }
 0x1c8   : > { %s2231_s26 = sshll.u32 %s4245_s1, 7  ;;  %s4255_s17 = sld [smem:[#allocation50_spill]] }
 0x1c9   : > { %s4254_s29 = scalar_select %p3872_p11, 1, 0 }
 0x1ca   : > { %s669_s30 = scalar_lea.vmem [#allocation2], %s2230_s27  ;;  %p3887_p12 = pnand %p2597_p9, %p3853_p3 }
 0x1cb   : > { %s676_s25 = sshll.u32 %s669_s30, 4  ;;  %s666_s18 = scalar_lea.sflag [#allocation3], %s3866_s22  ;;  %s3883_s25 = int_to_ptr.vmem [resolvable:$true] %s676_s25 }
 0x1cc   : > { %p3169_p8 = pneg %p3887_p12 }
 0x1ce   : > { %s3881_s24 = scalar_lea.hbm %s4255_s17, %s2231_s26  ;;  %s3172_s19 = scalar_lea.hbm %s4255_s17, 256 }
 0x1cf   : > { %s3167_s26 = scalar_lea.hbm %s3881_s24, 128  ;;  %p3173_p1 = scmp.lt.u32.totalorder %s3881_s24, %s4255_s17 }
 0x1d0   : > { %p3168_p4 = scmp.ne.s32.totalorder %s3881_s24, %s3167_s26  ;;  %p3174_p3 = scmp.lt.u32.totalorder %s3172_s19, %s3167_s26 }
 0x1d1   : > { %p3176_p5 = scmp.lt.u32.totalorder %s3167_s26, %s3881_s24 }
 0x1d2   : > { %p3170_p13 = pnand %p3169_p8, %p3168_p4  ;;  %p3175_p2 = por %p3174_p3, %p3173_p1 }
 0x1d4   : > { %p3171_p0 = pneg %p3170_p13  ;;  %p3177_p7 = por %p3176_p5, %p3175_p2 }
 0x1d6   : > { %p3178_p9 = pnand %p3177_p7, %p3171_p0 }
 0x1d8   : > { %3181 = shalt.err (!%p3178_p9)
}
 0x1d9   : > { %s3182_s3 = scalar_lea.vmem %s3883_s25, 128  ;;  %s3353_s27 = smov [#allocation2]  }
 0x1da   : > { %p3183_p4 = scmp.ne.s32.totalorder %s3883_s25, %s3182_s3  ;;  %s3187_s21 = sshll.u32 %s3353_s27, 4  ;;  %s3188_s21 = int_to_ptr.vmem [resolvable:$false] %s3187_s21 }
 0x1db   : > { %s3189_s5 = scalar_lea.vmem %s3188_s21, 256  ;;  %p3190_p10 = scmp.lt.s32.totalorder %s3883_s25, %s3188_s21 }
 0x1dc   : > { %p3185_p13 = pnand %p3183_p4, %p3169_p8  ;;  %p3191_p1 = scmp.lt.s32.totalorder %s3189_s5, %s3182_s3 }
 0x1de   : > { %p3186_p11 = pneg %p3185_p13  ;;  %p3192_p3 = por %p3191_p1, %p3190_p10 }
 0x1e0   : > { %p3193_p2 = pnand %p3192_p3, %p3186_p11 }
 0x1e2   : > { %3196 = shalt.err (!%p3193_p2)
}
 0x1e3   : > { %2573 = dma.hbm_to_vmem [thread:$0]  (!%p3887_p12), %s3881_s24, 128, %s3883_s25, %s666_s18  }
 0x1e4   : > { %s2233_s26 = sshll.u32 %s4245_s1, 6  ;;  %s4257_s27 = sld [smem:[#allocation51_spill]] }
 0x1e5   : > { %s4259_s21 = sshll.u32 %s3866_s22, 2  ;;  %s4260_s7 = sand.u32 1, %s4245_s1  }
 0x1e6   : > { %s687_s3 = scalar_lea.vmem [#allocation5], %s4259_s21  ;;  %s684_s8 = scalar_lea.sflag [#allocation6], %s4260_s7 }
 0x1e7   : > { %s694_s5 = sshll.u32 %s687_s3, 4  ;;  %s695_s5 = int_to_ptr.vmem [resolvable:$true] %s694_s5 }
 0x1ea   : > { %s4258_s4 = smov %s4257_s27  ;;  %s3923_s6 = scalar_lea.hbm %s4257_s27, %s2233_s26 }
 0x1eb   : > { %s3197_s9 = scalar_lea.hbm %s3923_s6, 64  ;;  %s3202_s18 = scalar_lea.hbm %s4258_s4, 128 }
 0x1ec   : > { %p3198_p10 = scmp.ne.s32.totalorder %s3923_s6, %s3197_s9  ;;  %p3203_p5 = scmp.lt.u32.totalorder %s3923_s6, %s4258_s4 }
 0x1ed   : > { %p3204_p7 = scmp.lt.u32.totalorder %s3202_s18, %s3197_s9  ;;  %p3206_p4 = scmp.lt.u32.totalorder %s3197_s9, %s3923_s6 }
 0x1ee   : > { %p3200_p11 = pnand %p3198_p10, %p3169_p8 }
 0x1ef   : > { %p3205_p9 = por %p3204_p7, %p3203_p5 }
 0x1f0   : > { %p3201_p0 = pneg %p3200_p11 }
 0x1f1   : > { %p3207_p13 = por %p3206_p4, %p3205_p9 }
 0x1f3   : > { %p3208_p1 = pnand %p3207_p13, %p3201_p0 }
 0x1f5   : > { %3211 = shalt.err (!%p3208_p1)
}
 0x1f6   : > { %s3212_s7 = scalar_lea.vmem %s695_s5, 64  ;;  %s3354_s1 = smov [#allocation5]  }
 0x1f7   : > { %p3213_p3 = scmp.ne.s32.totalorder %s695_s5, %s3212_s7  ;;  %s3217_s19 = sshll.u32 %s3354_s1, 4  ;;  %s3218_s19 = int_to_ptr.vmem [resolvable:$false] %s3217_s19 }
 0x1f8   : > { %s3219_s30 = scalar_lea.vmem %s3218_s19, 128  ;;  %p3220_p11 = scmp.lt.s32.totalorder %s695_s5, %s3218_s19 }
 0x1f9   : > { %p3215_p2 = pnand %p3213_p3, %p3169_p8  ;;  %p3221_p6 = scmp.lt.s32.totalorder %s3219_s30, %s3212_s7 }
 0x1fb   : > { %p3216_p10 = pneg %p3215_p2  ;;  %p3222_p5 = por %p3221_p6, %p3220_p11 }
 0x1fd   : > { %p3223_p7 = pnand %p3222_p5, %p3216_p10 }
 0x1ff   : > { %3226 = shalt.err (!%p3223_p7)
}
 0x200   : > { %2576 = dma.hbm_to_vmem [thread:$0]  (!%p3887_p12), %s3923_s6, 64, %s695_s5, %s684_s8  }
 0x201   : > { %s4261_s9 = sld [smem:[#allocation49_spill]] }
 0x207   : > { %p4262_p0 = scmp.ne.s32.totalorder %s4261_s9, 0 }
 0x208   : > { %s4263_s27 = sld [smem:[#allocation45_spill]] (!%p4262_p0)  ;;  %p4264_p6 = scmp.ne.s32.totalorder (!%p4262_p0), %s4252_s0, 0 }
 0x209   : > { %703 = sbr.rel (%p4262_p0) target bundleno = 4745 (0x1289), region = 92 }
 0x20e   : > { %s3951_s21 = sand.u32 (!%p4262_p0), 1, %s4263_s27  }
 0x20f   : > { %s2235_s3 = sshll.u32 (!%p4262_p0), %s3951_s21, 3  ;;  %s706_s24 = scalar_lea.sflag (!%p4262_p0), [#allocation3], %s3951_s21 }
 0x210   : > { %s3957_s25 = scalar_lea.vmem [#allocation2], %s2235_s3 }
 0x211   : > { %3272 = dma.done.wait (%p4264_p6), %s706_s24, 128  }
 0x212   : > { %3274 = vsyncadd (%p4264_p6), %s706_s24, 4294967168  ;;  %s4265_s6 = sld [smem:[#allocation48_spill]]  ;;  %s2236_s23 = sshll.u32 %s3951_s21, 2 }
 0x213   : > { %s718_s18 = scalar_lea.vmem [#allocation5], %s2236_s23 }
 0x218   : > { %s714_s8 = sand.u32 1, %s4265_s6  }
 0x219   : > { %s715_s5 = scalar_lea.sflag [#allocation6], %s714_s8 }
 0x21a   : > { %3276 = dma.done.wait (%p4264_p6), %s715_s5, 64  }
 0x21b   : > { %3278 = vsyncadd (%p4264_p6), %s715_s5, 4294967232  ;;  %p4266_p12 = scmp.eq.s32.totalorder %s4265_s6, 0 }
 0x21d   : > { %3280 = dma.done.wait (%p4266_p12), [#allocation6], 16   ;;  %p4267_p8 = pmov %p4266_p12 }
 0x21f   : > { %3282 = vsyncadd (%p4267_p8), [#allocation6], 4294967280  ;;  %p4268_p9 = pmov %p4267_p8 }
 0x220   : > { %p4269_p4 = pmov %p4267_p8 }
 0x221   : > { %3284 = dma.done.wait (%p4268_p9), [#allocation9], 144  }
 0x222   : > { %3286 = vsyncadd (%p4269_p4), [#allocation9], 4294967152  ;;  %p4270_p13 = pmov %p4269_p4 }
 0x223   : > { %p4271_p1 = pmov %p4269_p4 }
 0x224   : > { %3288 = dma.done.wait (%p4270_p13), [#allocation12], 272  }
 0x225   : > { %3290 = vsyncadd (%p4271_p1), [#allocation12], 4294967024  ;;  %p4272_p3 = pmov %p4271_p1 }
 0x226   : > { %p4273_p2 = pmov %p4271_p1 }
 0x227   : > { %3292 = dma.done.wait (%p4272_p3), [#allocation15], 272  }
 0x228   : > { %3294 = vsyncadd (%p4273_p2), [#allocation15], 4294967024  ;;  %p4274_p10 = pmov %p4271_p1 }
 0x229   : > { %p4275_p11 = pmov %p4271_p1 }
 0x22a   : > { %3296 = dma.done.wait (%p4274_p10), [#allocation18], 272  }
 0x22b   : > { %3298 = vsyncadd (%p4275_p11), [#allocation18], 4294967024  ;;  %p4276_p5 = pmov %p4271_p1 }
 0x22c   : > { %p4277_p7 = pmov %p4271_p1 }
 0x22d   : > { %3300 = dma.done.wait (%p4276_p5), [#allocation21], 32  }
 0x22e   : > { %3302 = vsyncadd (%p4277_p7), [#allocation21], 4294967264  ;;  %p4278_p0 = pmov %p4271_p1 }
 0x230   : > { %3304 = dma.done.wait (%p4278_p0), [#allocation24], 272   ;;  %p4279_p6 = pmov %p4278_p0 }
 0x231   : > { %p4280_p12 = pmov %p4278_p0 }
 0x232   : > { %3306 = vsyncadd (%p4279_p6), [#allocation24], 4294967024 }
 0x233   : > { %3308 = dma.done.wait (%p4280_p12), [#allocation27], 528   ;;  %p4281_p8 = pmov %p4278_p0 }
 0x234   : > { %p4282_p9 = pmov %p4278_p0 }
 0x235   : > { %3310 = vsyncadd (%p4281_p8), [#allocation27], 4294966768 }
 0x236   : > { %3312 = dma.done.wait (%p4282_p9), [#allocation30], 16   ;;  %p4283_p4 = pmov %p4278_p0 }
 0x237   : > { %vm845_vm0 = vcmask 125952   ;;  %v842_v0 = vld [vmem:[%s718_s18] sm:$0xf]  ;;  %v2678_v7 = vld [vmem:[#allocation10] sm:$0xff]   ;;  %v3355_v8 = vmov 0.0   ;;  %vm3356_vm1 = vmmov 0  }
 0x238   : > { %3314 = vsyncadd (%p4283_p4), [#allocation30], 4294967280  ;;  %v846_v1 = vsel %vm845_vm0, %v842_v0, 0.0  ;;  %2337 = vmatprep.subr.bf16.mxu1 %v3355_v8  ;;  %2339 = vmatprep.mubr.msk.bf16.mxu1 %vm3356_vm1, %v3355_v8  ;;  %v4013_v9 = vld [vmem:[%s3957_s25] sm:$0xff]  ;;  %vm971_vm2 = vcmask 261120   ;;  %vm883_vm3 = vcmask 130048  }
 0x239   : > { %847 = vadd.xlane.f32.xlu0 %v846_v1  ;;  %2338 = vmatpush3.bf16.msra.mxu1 %v2678_v7  ;;  %v1017_v10 = vsel %vm971_vm2, %v4013_v9, 0.0  ;;  %v2254_v15 = vld [vmem:[#allocation7] ss:$0 sm:$0xff]  ;;  %v2255_v17 = vld [vmem:[#allocation8] ss:$0 sm:$0xff]  ;;  %v2679_v26 = vld [vmem:[#allocation11] sm:$0xff]  }
 0x23a   : > { %2351 = vmatprep.subr.bf16.mxu0 %v3355_v8  ;;  %2343 = vmatprep.subr.bf16.mxu1 %v3355_v8  ;;  %v2680_v27 = vld [vmem:[#allocation11 + $0x8] sm:$0xff]   ;;  %v2681_v28 = vld [vmem:[#allocation16] sm:$0xff]   ;;  %v2682_v59 = vld [vmem:[#allocation16 + $0x8] sm:$0xff]   ;;  %s3357_s0 = smov 88   ;;  %s3358_s22 = smov 96   ;;  %vm1122_vm5 = vcmask 64512  }
 0x23b   : > { %2355 = vmatprep.mubr.msk.bf16.mxu0 %vm3356_vm1, %v3355_v8  ;;  %1018 = vadd.xlane.f32.xlu1 %v1017_v10  ;;  %v2261_v1 = vld [vmem:[#allocation13] ss:$0 sm:$0xff]  ;;  %s3359_s26 = smov 120   ;;  %vm1169_vm6 = vcmask 97280   ;;  %s3360_s7 = smov 64   ;;  %vm1187_vm7 = vcmask 1045504  }
 0x23c   : > { %2352 = vmatpush3.bf16.msra.mxu0 %v2681_v28  ;;  %s3361_s1 = smov 80   ;;  %s3362_s19 = smov 112   ;;  %vm1347_vm8 = vcmask 1043456   ;;  %vm1906_vm9 = vcmask 523264  }
 0x23d   : > { %2353 = vmatprep.subr.bf16.mxu0 %v3355_v8  ;;  %s3363_s30 = smov 56   ;;  %s3364_s9 = smov 72  }
 0x23e   : > { %s3365_s27 = smov 104   ;;  %s3366_s24 = smov 48  }
 0x23f   : > { %s3367_s25 = smov 40   ;;  %s2294_s8 = sshll.u32 %s4265_s6, 7 }
 0x240   : > { %2354 = vmatpush3.bf16.msra.mxu0 %v2682_v59  ;;  %s839_s23 = scalar_lea.vmem [#allocation31], %s2235_s3  ;;  %s1953_s6 = scalar_lea.sflag [#allocation4], %s3951_s21 }
 0x241   : > { %2365 = vmatprep.subr.bf16.mxu0 %v3355_v8  ;;  %s1966_s5 = sshll.u32 %s839_s23, 4  ;;  %p4285_p1 = scmp.ne.s32.totalorder %s4253_s28, 0  ;;  %s4134_s5 = int_to_ptr.vmem [resolvable:$true] %s1966_s5 }
 0x242   : > { %s3227_s3 = scalar_lea.vmem %s4134_s5, 128 }
 0x243   : > { %p3228_p13 = scmp.ne.s32.totalorder %s4134_s5, %s3227_s3 }
 0x245   : > { %p3229_p3 = pnand %p3228_p13, %p4285_p1 }
 0x247   : > { %p3230_p2 = pneg %p3229_p3 }
 0x2c6   : > { %v848_v2 = vpop.xlane.xlu0 %847 }
 0x2c7   : > { %v850_v3 = vmul.f32 0.0625, %v848_v2 }
 0x2c8   : > { %v1019_v21 = vpop.xlane.xlu1 %1018 }
 0x2c9   : > { %v851_v4 = vsub.f32 %v842_v0, %v850_v3  ;;  %v1021_v22 = vmul.f32 0.03125, %v1019_v21  ;;  %v2262_v3 = vld [vmem:[#allocation14] ss:$0 sm:$0xff] }
 0x2cb   : > { %v852_v5 = vmul.f32 %v851_v4, %v851_v4  ;;  %v1022_v23 = vsub.f32 %v4013_v9, %v1021_v22 }
 0x2cd   : > { %v853_v6 = vsel %vm845_vm0, %v852_v5, 0.0  ;;  %v1023_v24 = vmul.f32 %v1022_v23, %v1022_v23 }
 0x2ce   : > { %854 = vadd.xlane.f32.xlu0 %v853_v6 }
 0x2cf   : > { %v1024_v25 = vsel %vm971_vm2, %v1023_v24, 0.0 }
 0x2d0   : > { %1025 = vadd.xlane.f32.xlu1 %v1024_v25 }
 0x35b   : > { %v855_v11 = vpop.xlane.xlu0 %854 }
 0x35c   : > { %v856_v12 = vmul.f32 0.0625, %v855_v11 }
 0x35d   : > { %v1026_v60 = vpop.xlane.xlu1 %1025 }
 0x35e   : > { %v857_v13 = vadd.f32 1e-05, %v856_v12  ;;  %v1027_v61 = vmul.f32 0.03125, %v1026_v60  ;;  %v2263_v12 = vld [vmem:[#allocation17] ss:$0 sm:$0xff] }
 0x35f   : > { %v1115_v60 = vld [vmem:[#allocation19 + $0x4] sm:$0xf] }
 0x360   : > { %2689 = vrsqrt.f32 %v857_v13  ;;  %v1028_v62 = vadd.f32 1e-05, %v1027_v61  ;;  %v1349_v61 = vsel %vm1347_vm8, %v1115_v60, 0 }
 0x36a   : > { %v2690_v14 = vpop.eup %2689 }
 0x36b   : > { %v859_v16 = vmul.f32 %v2690_v14, %v851_v4 }
 0x36d   : > { %v866_v18 = vmul.f32 %v2254_v15, %v859_v16 }
 0x36f   : > { %v873_v19 = vadd.f32 %v2255_v17, %v866_v18 }
 0x371   : > { %v874_v20 = vpack.c.bf16 %v873_v19, %v873_v19 }
 0x373   : > { %2340 = vmatmul.mubr.msk.bf16.vlgmr.msra.gmra.mrb[0].mxu1 %vm883_vm3, %v874_v20 }
 0x374   : > { %2347 = vmatprep.mubr.msk.bf16.mxu1 %vm3356_vm1, %v3355_v8  ;;  %2344 = vmatpush3.bf16.msra.mxu1 %v2679_v26 }
 0x375   : > { %2345 = vmatprep.subr.bf16.mxu1 %v3355_v8 }
 0x378   : > { %2346 = vmatpush3.bf16.msra.mxu1 %v2680_v27 }
 0x379   : > { %2359 = vmatprep.subr.bf16.mxu1 %v3355_v8 }
 0x446   : > { %v921_v29 = vpop.f32.mrb[0].mxu1 }
 0x447   : > { %v928_v30 = vmul.f32 0.70710677, %v921_v29  ;;  %v2341_v31 = vpop.f32.mrb[1].mxu1  ;;  %v927_v55 = vmul.f32 0.5, %v921_v29 }
 0x448   : > { %v924_v32 = vpop.f32.mrb[2].mxu1 }
 0x449   : > { %v929_v33 = vand.u32 2147483647, %v928_v30  ;;  %v2342_v34 = vpop.f32.mrb[3].mxu1  ;;  %vm949_vm4 = vcmp.ge.f32.partialorder %v928_v30, 0.0 }
 0x44b   : > { %v930_v35 = vmul.f32 0.3275911, %v929_v33  ;;  %v943_v37 = vsub.f32 0.0, %v929_v33 }
 0x44d   : > { %v931_v36 = vadd.f32 1.0, %v930_v35  ;;  %v944_v39 = vmul.f32 %v943_v37, %v929_v33 }
 0x44f   : > { %2691 = vrcp.f32 %v931_v36  ;;  %v945_v42 = vmul.f32 1.442695, %v944_v39 }
 0x451   : > { %2693 = vpow2.f32 %v945_v42 }
 0x452   : > { %2695 = vrsqrt.f32 %v1028_v62 }
 0x459   : > { %v2692_v38 = vpop.eup %2691 }
 0x45a   : > { %v934_v40 = vmul.f32 1.0614054, %v2692_v38 }
 0x45b   : > { %v2694_v50 = vpop.eup %2693 }
 0x45c   : > { %v935_v41 = vadd.f32 -1.4531521, %v934_v40  ;;  %v2696_v63 = vpop.eup %2695 }
 0x45d   : > { %v1030_v0 = vmul.f32 %v2696_v63, %v1022_v23 }
 0x45e   : > { %v936_v43 = vmul.f32 %v2692_v38, %v935_v41 }
 0x45f   : > { %v1037_v2 = vmul.f32 %v2261_v1, %v1030_v0 }
 0x460   : > { %v937_v44 = vadd.f32 1.4214138, %v936_v43 }
 0x461   : > { %v1044_v4 = vadd.f32 %v2262_v3, %v1037_v2 }
 0x462   : > { %v938_v45 = vmul.f32 %v2692_v38, %v937_v44 }
 0x464   : > { %v939_v46 = vadd.f32 -0.28449672, %v938_v45 }
 0x466   : > { %v940_v47 = vmul.f32 %v2692_v38, %v939_v46 }
 0x468   : > { %v941_v48 = vadd.f32 0.2548296, %v940_v47 }
 0x46a   : > { %v942_v49 = vmul.f32 %v2692_v38, %v941_v48 }
 0x46c   : > { %v947_v51 = vmul.f32 %v2694_v50, %v942_v49 }
 0x46e   : > { %v948_v52 = vsub.f32 1.0, %v947_v51 }
 0x470   : > { %v950_v53 = vsub.f32 0.0, %v948_v52 }
 0x472   : > { %v951_v54 = vsel %vm949_vm4, %v948_v52, %v950_v53 }
 0x473   : > { %v952_v56 = vadd.f32 1.0, %v951_v54 }
 0x475   : > { %v953_v57 = vmul.f32 %v952_v56, %v927_v55 }
 0x477   : > { %v954_v58 = vpack.c.bf16 %v953_v57, %v953_v57 }
 0x479   : > { %2348 = vmatmul.mubr.msk.bf16.vlgmr.msra.gmra.mrb[4].mxu1 %vm971_vm2, %v954_v58  ;;  %v1114_v58 = vld [vmem:[#allocation19] sm:$0xf] }
 0x47a   : > { %2361 = vmatprep.mubr.msk.bf16.mxu1 %vm3356_vm1, %v3355_v8  ;;  %v1395_v59 = vsel %vm1347_vm8, %v1114_v58, 0 }
 0x54c   : > { %v1009_v5 = vpop.f32.mrb[4].mxu1 }
 0x54d   : > { %v1045_v6 = vpack.c.bf16 %v1009_v5, %v1044_v4  ;;  %v2349_v7 = vpop.f32.mrb[5].mxu1 }
 0x54e   : > { %v1012_v10 = vpop.f32.mrb[6].mxu1 }
 0x54f   : > { %v2350_v11 = vpop.f32.mrb[7].mxu1  ;;  %2356 = vmatmul.mubr.msk.bf16.vlgmr.msra.gmra.mrb[0].mxu0 %vm971_vm2, %v1045_v6 }
 0x550   : > { %2367 = vmatprep.mubr.msk.bf16.mxu0 %vm3356_vm1, %v3355_v8 }
 0x622   : > { %v1106_v13 = vpop.f32.mrb[0].mxu0 }
 0x623   : > { %v2357_v14 = vpop.f32.mrb[1].mxu0  ;;  %v1107_v16 = vadd.f32 %v2263_v12, %v1106_v13 }
 0x624   : > { %v1109_v15 = vpop.f32.mrb[2].mxu0 }
 0x625   : > { %v1110_v17 = vadd.f32 %v2263_v12, %v1109_v15  ;;  %v2358_v18 = vpop.f32.mrb[3].mxu0  ;;  %v4035_v20 = vpack.c.bf16 %v1107_v16, %v1107_v16 }
 0x627   : > { %v4031_v19 = vpack.c.bf16 %v1110_v17, %v1107_v16 }
 0x629   : > { %1235 = vrot.lane.b32.xlu1 %v4031_v19, %s3357_s0  ;;  %1120 = vrot.lane.b32.xlu0 %v4031_v19, %s3358_s22  ;;  %s4284_s22 = sld [smem:[#allocation61_spill]] }
 0x62d   : > { %1233 = vrot.lane.b32.xlu1 %v4035_v20, %s3359_s26 }
 0x62f   : > { %s4132_s26 = scalar_lea.hbm %s4284_s22, %s2294_s8 }
 0x69b   : > { %v1121_v21 = vpop.permute.xlu0 %1120  ;;  %v1236_v23 = vpop.permute.xlu1 %1235 }
 0x69c   : > { %v1127_v22 = vsel %vm1122_vm5, %v1121_v21, 0  ;;  %v1241_v24 = vsel %vm1122_vm5, %v1236_v23, 0 }
 0x69d   : > { %2360 = vmatpush3.bf16.xpose.msra.mxu1 %v1127_v22 }
 0x69e   : > { %2371 = vmatprep.subr.bf16.mxu1 %v3355_v8 }
 0x69f   : > { %v1234_v25 = vpop.permute.xlu1 %1233 }
 0x6a4   : > { %2362 = vmatmul.mubr.msk.bf16.vlgmr.msra.gmra.mrb[8].mxu1 %vm1122_vm5, %v4035_v20 }
 0x6a5   : > { %2372 = vmatpush3.bf16.xpose.msra.mxu1 %v1241_v24  ;;  %2373 = vmatprep.mubr.msk.bf16.mxu1 %vm3356_vm1, %v3355_v8 }
 0x6a6   : > { %2383 = vmatprep.subr.bf16.mxu1 %v3355_v8 }
 0x6ac   : > { %2374 = vmatmul.mubr.msk.bf16.vlgmr.msra.gmra.mrb[12].mxu1 %vm1122_vm5, %v1234_v25 }
 0x6ad   : > { %2385 = vmatprep.mubr.msk.bf16.mxu1 %vm3356_vm1, %v3355_v8  ;;  %2384 = vmatpush3.bf16.msra.mxu1 %v1349_v61  ;;  %v1117_v61 = vld [vmem:[#allocation19 + $0xc] sm:$0xf] }
 0x6ae   : > { %2395 = vmatprep.subr.bf16.mxu1 %v3355_v8 }
 0x777   : > { %v1163_v26 = vpop.f32.mrb[8].mxu1 }
 0x778   : > { %v2363_v27 = vpop.f32.mrb[9].mxu1  ;;  %v1170_v28 = vsel %vm1169_vm6, %v1163_v26, -inf }
 0x779   : > { %1171 = vmax.xlane.f32.xlu1 %v1170_v28  ;;  %v1166_v29 = vpop.f32.mrb[10].mxu1 }
 0x77a   : > { %v2364_v30 = vpop.f32.mrb[11].mxu1 }
 0x77f   : > { %v1277_v31 = vpop.f32.mrb[12].mxu1 }
 0x780   : > { %v2375_v32 = vpop.f32.mrb[13].mxu1  ;;  %v1283_v33 = vsel %vm1169_vm6, %v1277_v31, -inf }
 0x781   : > { %1284 = vmax.xlane.f32.xlu0 %v1283_v33  ;;  %v1280_v34 = vpop.f32.mrb[14].mxu1 }
 0x782   : > { %v2376_v35 = vpop.f32.mrb[15].mxu1 }
 0x78a   : > { %1182 = vrot.lane.b32.xlu1 %v4031_v19, %s3360_s7  ;;  %s3368_s7 = smov [#allocation31]  }
 0x78e   : > { %1439 = vrot.lane.b32.xlu1 %v4031_v19, %s3361_s1  ;;  %s3231_s1 = sshll.u32 %s3368_s7, 4  ;;  %s3232_s1 = int_to_ptr.vmem [resolvable:$false] %s3231_s1 }
 0x78f   : > { %p3234_p10 = scmp.lt.s32.totalorder %s4134_s5, %s3232_s1 }
 0x792   : > { %1437 = vrot.lane.b32.xlu1 %v4035_v20, %s3362_s19  ;;  %s3233_s19 = scalar_lea.vmem %s3232_s1, 256 }
 0x793   : > { %p3235_p11 = scmp.lt.s32.totalorder %s3233_s19, %s3227_s3 }
 0x795   : > { %p3236_p5 = por %p3235_p11, %p3234_p10 }
 0x797   : > { %p3237_p7 = pnand %p3236_p5, %p3230_p2 }
 0x806   : > { %v1172_v36 = vpop.xlane.xlu1 %1171 }
 0x807   : > { %v1173_v37 = vsub.f32 %v1163_v26, %v1172_v36 }
 0x809   : > { %v1174_v38 = vmul.f32 1.442695, %v1173_v37 }
 0x80a   : > { %v1183_v39 = vpop.permute.xlu1 %1182 }
 0x80b   : > { %2697 = vpow2.f32 %v1174_v38  ;;  %v1189_v40 = vsel %vm1187_vm7, %v1183_v39, 0 }
 0x80c   : > { %2366 = vmatpush3.bf16.msra.mxu0 %v1189_v40 }
 0x80d   : > { %2377 = vmatprep.subr.bf16.mxu0 %v3355_v8 }
 0x80e   : > { %v1285_v41 = vpop.xlane.xlu0 %1284  ;;  %v1440_v3 = vpop.permute.xlu1 %1439 }
 0x80f   : > { %v1286_v42 = vsub.f32 %v1277_v31, %v1285_v41  ;;  %v1445_v10 = vsel %vm1122_vm5, %v1440_v3, 0 }
 0x811   : > { %v1287_v43 = vmul.f32 1.442695, %v1286_v42  ;;  %v1116_v42 = vld [vmem:[#allocation19 + $0x8] sm:$0xf] }
 0x812   : > { %v1438_v12 = vpop.permute.xlu1 %1437 }
 0x813   : > { %2699 = vpow2.f32 %v1287_v43  ;;  %v1552_v43 = vsel %vm1347_vm8, %v1116_v42, 0  ;;  %v2687_v42 = vld [vmem:[#allocation28 + $0x10] sm:$0xff]  }
 0x815   : > { %v2698_v44 = vpop.eup %2697 }
 0x816   : > { %v1176_v45 = vsel %vm1169_vm6, %v2698_v44, 0.0 }
 0x817   : > { %1177 = vadd.xlane.f32.xlu0 %v1176_v45 }
 0x81d   : > { %v2700_v46 = vpop.eup %2699 }
 0x81e   : > { %v1289_v47 = vsel %vm1169_vm6, %v2700_v46, 0.0 }
 0x81f   : > { %1290 = vadd.xlane.f32.xlu0 %v1289_v47 }
 0x835   : > { %1295 = vrot.lane.b32.xlu0 %v4031_v19, %s3363_s30 }
 0x8a4   : > { %v1178_v48 = vpop.xlane.xlu0 %1177 }
 0x8a5   : > { %2701 = vrcp.f32 %v1178_v48 }
 0x8ac   : > { %v1291_v49 = vpop.xlane.xlu0 %1290 }
 0x8ad   : > { %2703 = vrcp.f32 %v1291_v49 }
 0x8af   : > { %v2702_v50 = vpop.eup %2701 }
 0x8b0   : > { %v1180_v51 = vmul.f32 %v2702_v50, %v2698_v44  ;;  %v1296_v52 = vpop.permute.xlu0 %1295 }
 0x8b1   : > { %v1301_v54 = vsel %vm1187_vm7, %v1296_v52, 0 }
 0x8b2   : > { %v1181_v53 = vpack.c.bf16 %v1180_v51, %v1180_v51 }
 0x8b4   : > { %2368 = vmatmul.mubr.msk.bf16.vlgmr.msra.gmra.mrb[4].mxu0 %vm1169_vm6, %v1181_v53 }
 0x8b5   : > { %2378 = vmatpush3.bf16.msra.mxu0 %v1301_v54  ;;  %2379 = vmatprep.mubr.msk.bf16.mxu0 %vm3356_vm1, %v3355_v8 }
 0x8b6   : > { %2389 = vmatprep.subr.bf16.mxu0 %v3355_v8 }
 0x8b7   : > { %v2704_v55 = vpop.eup %2703 }
 0x8b8   : > { %v1293_v56 = vmul.f32 %v2704_v55, %v2700_v46 }
 0x8ba   : > { %v1294_v57 = vpack.c.bf16 %v1293_v56, %v1293_v56 }
 0x8bc   : > { %2380 = vmatmul.mubr.msk.bf16.vlgmr.msra.gmra.mrb[8].mxu0 %vm1169_vm6, %v1294_v57 }
 0x8bd   : > { %2391 = vmatprep.mubr.msk.bf16.mxu0 %vm3356_vm1, %v3355_v8  ;;  %2390 = vmatpush3.bf16.msra.mxu0 %v1395_v59 }
 0x8be   : > { %2401 = vmatprep.subr.bf16.mxu0 %v3355_v8 }
 0x987   : > { %v1225_v62 = vpop.f32.mrb[4].mxu0 }
 0x988   : > { %v1231_v63 = vpack.c.bf16 %v1225_v62, %v1225_v62  ;;  %v2369_v0 = vpop.f32.mrb[5].mxu0  ;;  %v1710_v62 = vsel %vm1347_vm8, %v1117_v61, 0 }
 0x989   : > { %v1228_v1 = vpop.f32.mrb[6].mxu0 }
 0x98a   : > { %v2370_v2 = vpop.f32.mrb[7].mxu0  ;;  %2392 = vmatmul.mubr.msk.bf16.vlgmr.msra.gmra.mrb[12].mxu0 %vm1122_vm5, %v1231_v63 }
 0x98b   : > { %2403 = vmatprep.mubr.msk.bf16.mxu0 %vm3356_vm1, %v3355_v8 }
 0x98f   : > { %v1337_v4 = vpop.f32.mrb[8].mxu0 }
 0x990   : > { %v1343_v5 = vpack.c.bf16 %v1337_v4, %v1337_v4  ;;  %v2381_v6 = vpop.f32.mrb[9].mxu0 }
 0x991   : > { %v1340_v7 = vpop.f32.mrb[10].mxu0 }
 0x992   : > { %v2382_v11 = vpop.f32.mrb[11].mxu0  ;;  %2386 = vmatmul.mubr.msk.bf16.vlgmr.msra.gmra.mrb[16].mxu1 %vm1122_vm5, %v1343_v5 }
 0x993   : > { %2396 = vmatpush3.bf16.xpose.msra.mxu1 %v1445_v10  ;;  %2397 = vmatprep.mubr.msk.bf16.mxu1 %vm3356_vm1, %v3355_v8 }
 0x994   : > { %2407 = vmatprep.subr.bf16.mxu1 %v3355_v8 }
 0x99a   : > { %2398 = vmatmul.mubr.msk.bf16.vlgmr.msra.gmra.mrb[20].mxu1 %vm1122_vm5, %v1438_v12 }
 0x99b   : > { %2409 = vmatprep.mubr.msk.bf16.mxu1 %vm3356_vm1, %v3355_v8  ;;  %2408 = vmatpush3.bf16.msra.mxu1 %v1552_v43  ;;  %v2688_v43 = vld [vmem:[#allocation28 + $0x18] sm:$0xff]  }
 0x99c   : > { %2419 = vmatprep.subr.bf16.mxu1 %v3355_v8 }
 0xa5d   : > { %v1431_v13 = vpop.f32.mrb[12].mxu0 }
 0xa5e   : > { %v2393_v14 = vpop.f32.mrb[13].mxu0 }
 0xa5f   : > { %v1434_v15 = vpop.f32.mrb[14].mxu0 }
 0xa60   : > { %v2394_v16 = vpop.f32.mrb[15].mxu0 }
 0xa65   : > { %v1385_v17 = vpop.f32.mrb[16].mxu1 }
 0xa66   : > { %v4082_v18 = vadd.f32 %v1431_v13, %v1385_v17  ;;  %v2387_v21 = vpop.f32.mrb[17].mxu1  ;;  %v2279_v17 = vld [vmem:[#allocation20] ss:$0 sm:$0xff] }
 0xa67   : > { %v1388_v22 = vpop.f32.mrb[18].mxu1 }
 0xa68   : > { %v2388_v23 = vpop.f32.mrb[19].mxu1 }
 0xa6d   : > { %v1481_v24 = vpop.f32.mrb[20].mxu1 }
 0xa6e   : > { %v2399_v25 = vpop.f32.mrb[21].mxu1  ;;  %v1487_v26 = vsel %vm1169_vm6, %v1481_v24, -inf }
 0xa6f   : > { %1488 = vmax.xlane.f32.xlu1 %v1487_v26  ;;  %v1484_v27 = vpop.f32.mrb[22].mxu1 }
 0xa70   : > { %v2400_v28 = vpop.f32.mrb[23].mxu1 }
 0xa80   : > { %1597 = vrot.lane.b32.xlu1 %v4031_v19, %s3364_s9 }
 0xa84   : > { %1595 = vrot.lane.b32.xlu1 %v4035_v20, %s3365_s27 }
 0xafc   : > { %v1489_v29 = vpop.xlane.xlu1 %1488 }
 0xafd   : > { %v1490_v30 = vsub.f32 %v1481_v24, %v1489_v29 }
 0xaff   : > { %v1491_v31 = vmul.f32 1.442695, %v1490_v30  ;;  %v2683_v30 = vld [vmem:[#allocation25] sm:$0xff]  }
 0xb00   : > { %v1598_v38 = vpop.permute.xlu1 %1597 }
 0xb01   : > { %2705 = vpow2.f32 %v1491_v31  ;;  %v1603_v40 = vsel %vm1122_vm5, %v1598_v38, 0  ;;  %v2684_v31 = vld [vmem:[#allocation25 + $0x8] sm:$0xff]  }
 0xb04   : > { %v1596_v41 = vpop.permute.xlu1 %1595 }
 0xb0b   : > { %v2706_v32 = vpop.eup %2705 }
 0xb0c   : > { %v1493_v33 = vsel %vm1169_vm6, %v2706_v32, 0.0 }
 0xb0d   : > { %1494 = vadd.xlane.f32.xlu0 %v1493_v33 }
 0xb23   : > { %1499 = vrot.lane.b32.xlu0 %v4031_v19, %s3366_s24 }
 0xb9a   : > { %v1495_v34 = vpop.xlane.xlu0 %1494 }
 0xb9b   : > { %2707 = vrcp.f32 %v1495_v34 }
 0xb9e   : > { %v1500_v35 = vpop.permute.xlu0 %1499 }
 0xb9f   : > { %v1505_v36 = vsel %vm1187_vm7, %v1500_v35, 0  ;;  %v2280_v35 = vld [vmem:[#allocation22] ss:$0 sm:$0xff] }
 0xba0   : > { %2402 = vmatpush3.bf16.msra.mxu0 %v1505_v36 }
 0xba1   : > { %2413 = vmatprep.subr.bf16.mxu0 %v3355_v8 }
 0xba5   : > { %v2708_v20 = vpop.eup %2707 }
 0xba6   : > { %v1497_v37 = vmul.f32 %v2708_v20, %v2706_v32  ;;  %v2281_v20 = vld [vmem:[#allocation23] ss:$0 sm:$0xff] }
 0xba8   : > { %v1498_v39 = vpack.c.bf16 %v1497_v37, %v1497_v37 }
 0xbaa   : > { %2404 = vmatmul.mubr.msk.bf16.vlgmr.msra.gmra.mrb[16].mxu0 %vm1169_vm6, %v1498_v39 }
 0xbab   : > { %2414 = vmatpush3.bf16.xpose.msra.mxu0 %v1603_v40  ;;  %2415 = vmatprep.mubr.msk.bf16.mxu0 %vm3356_vm1, %v3355_v8  ;;  %v2685_v40 = vld [vmem:[#allocation28] sm:$0xff]  }
 0xbac   : > { %2425 = vmatprep.subr.bf16.mxu0 %v3355_v8 }
 0xbb2   : > { %2416 = vmatmul.mubr.msk.bf16.vlgmr.msra.gmra.mrb[20].mxu0 %vm1122_vm5, %v1596_v41  ;;  %v2686_v41 = vld [vmem:[#allocation28 + $0x8] sm:$0xff]  }
 0xbb3   : > { %2427 = vmatprep.mubr.msk.bf16.mxu0 %vm3356_vm1, %v3355_v8  ;;  %2426 = vmatpush3.bf16.msra.mxu0 %v1710_v62 }
 0xbb4   : > { %2439 = vmatprep.subr.bf16.mxu0 %v3355_v8 }
 0xc7d   : > { %v1541_v44 = vpop.f32.mrb[16].mxu0 }
 0xc7e   : > { %v1547_v45 = vpack.c.bf16 %v1541_v44, %v1541_v44  ;;  %v2405_v46 = vpop.f32.mrb[17].mxu0  ;;  %v2282_v44 = vld [vmem:[#allocation26] ss:$0 sm:$0xff] }
 0xc7f   : > { %v1544_v47 = vpop.f32.mrb[18].mxu0 }
 0xc80   : > { %v2406_v48 = vpop.f32.mrb[19].mxu0  ;;  %2410 = vmatmul.mubr.msk.bf16.vlgmr.msra.gmra.mrb[24].mxu1 %vm1122_vm5, %v1547_v45 }
 0xc81   : > { %2421 = vmatprep.mubr.msk.bf16.mxu1 %vm3356_vm1, %v3355_v8 }
 0xc85   : > { %v1639_v49 = vpop.f32.mrb[20].mxu0 }
 0xc86   : > { %v2417_v50 = vpop.f32.mrb[21].mxu0  ;;  %v1645_v51 = vsel %vm1169_vm6, %v1639_v49, -inf }
 0xc87   : > { %1646 = vmax.xlane.f32.xlu0 %v1645_v51  ;;  %v1642_v52 = vpop.f32.mrb[22].mxu0 }
 0xc88   : > { %v2418_v53 = vpop.f32.mrb[23].mxu0 }
 0xc9d   : > { %1657 = vrot.lane.b32.xlu0 %v4031_v19, %s3367_s25 }
 0xd14   : > { %v1647_v54 = vpop.xlane.xlu0 %1646 }
 0xd15   : > { %v1648_v55 = vsub.f32 %v1639_v49, %v1647_v54 }
 0xd17   : > { %v1649_v56 = vmul.f32 1.442695, %v1648_v55 }
 0xd18   : > { %v1658_v57 = vpop.permute.xlu0 %1657 }
 0xd19   : > { %2709 = vpow2.f32 %v1649_v56  ;;  %v1663_v58 = vsel %vm1187_vm7, %v1658_v57, 0  ;;  %v2287_v56 = vld [vmem:[#allocation29] ss:$0 sm:$0xff] }
 0xd1a   : > { %2420 = vmatpush3.bf16.msra.mxu1 %v1663_v58 }
 0xd1b   : > { %2431 = vmatprep.subr.bf16.mxu1 %v3355_v8 }
 0xd23   : > { %v2710_v59 = vpop.eup %2709 }
 0xd24   : > { %v1651_v60 = vsel %vm1169_vm6, %v2710_v59, 0.0 }
 0xd25   : > { %1652 = vadd.xlane.f32.xlu1 %v1651_v60 }
 0xd53   : > { %v1588_v19 = vpop.f32.mrb[24].mxu1 }
 0xd54   : > { %v1594_v63 = vadd.f32 %v1588_v19, %v4082_v18  ;;  %v2411_v0 = vpop.f32.mrb[25].mxu1 }
 0xd55   : > { %v1591_v1 = vpop.f32.mrb[26].mxu1 }
 0xd56   : > { %v2412_v2 = vpop.f32.mrb[27].mxu1 }
 0xdb2   : > { %v1653_v3 = vpop.xlane.xlu1 %1652 }
 0xdb3   : > { %2711 = vrcp.f32 %v1653_v3 }
 0xdbd   : > { %v2712_v4 = vpop.eup %2711 }
 0xdbe   : > { %v1655_v5 = vmul.f32 %v2712_v4, %v2710_v59 }
 0xdc0   : > { %v1656_v6 = vpack.c.bf16 %v1655_v5, %v1655_v5 }
 0xdc2   : > { %2422 = vmatmul.mubr.msk.bf16.vlgmr.msra.gmra.mrb[28].mxu1 %vm1169_vm6, %v1656_v6 }
 0xdc3   : > { %2435 = vmatprep.mubr.msk.bf16.mxu1 %vm3356_vm1, %v3355_v8  ;;  %2432 = vmatpush3.bf16.msra.mxu1 %v2683_v30 }
 0xdc4   : > { %2433 = vmatprep.subr.bf16.mxu1 %v3355_v8 }
 0xdc7   : > { %2434 = vmatpush3.bf16.msra.mxu1 %v2684_v31 }
 0xe95   : > { %v1699_v7 = vpop.f32.mrb[28].mxu1 }
 0xe96   : > { %v1705_v10 = vpack.c.bf16 %v1699_v7, %v1699_v7  ;;  %v2423_v11 = vpop.f32.mrb[29].mxu1 }
 0xe97   : > { %v1702_v12 = vpop.f32.mrb[30].mxu1 }
 0xe98   : > { %v2424_v13 = vpop.f32.mrb[31].mxu1  ;;  %2428 = vmatmul.mubr.msk.bf16.vlgmr.msra.gmra.mrb[24].mxu0 %vm1122_vm5, %v1705_v10 }
 0xe99   : > { %2447 = vmatprep.mubr.msk.bf16.mxu0 %vm3356_vm1, %v3355_v8  ;;  %2440 = vmatpush3.bf16.msra.mxu0 %v2685_v40 }
 0xe9a   : > { %2441 = vmatprep.subr.bf16.mxu0 %v3355_v8 }
 0xe9d   : > { %2442 = vmatpush3.bf16.msra.mxu0 %v2686_v41 }
 0xe9e   : > { %2443 = vmatprep.subr.bf16.mxu0 %v3355_v8 }
 0xea1   : > { %2444 = vmatpush3.bf16.msra.mxu0 %v2687_v42 }
 0xea2   : > { %2445 = vmatprep.subr.bf16.mxu0 %v3355_v8 }
 0xea5   : > { %2446 = vmatpush3.bf16.msra.mxu0 %v2688_v43 }
 0xf6b   : > { %v1746_v14 = vpop.f32.mrb[24].mxu0 }
 0xf6c   : > { %v1752_v15 = vadd.f32 %v1746_v14, %v1594_v63  ;;  %v2429_v16 = vpop.f32.mrb[25].mxu0 }
 0xf6d   : > { %v1749_v18 = vpop.f32.mrb[26].mxu0 }
 0xf6e   : > { %v1753_v21 = vadd.f32 %v1752_v15, %v4013_v9  ;;  %v2430_v22 = vpop.f32.mrb[27].mxu0 }
 0xf70   : > { %v1761_v23 = vadd.f32 %v2279_v17, %v1753_v21 }
 0xf72   : > { %v1764_v24 = vsel %vm971_vm2, %v1761_v23, 0.0 }
 0xf73   : > { %1765 = vadd.xlane.f32.xlu1 %v1764_v24 }
0x1000   : > { %v1766_v25 = vpop.xlane.xlu1 %1765 }
0x1001   : > { %v1767_v26 = vmul.f32 0.03125, %v1766_v25 }
0x1003   : > { %v1768_v27 = vsub.f32 %v1761_v23, %v1767_v26 }
0x1005   : > { %v1769_v28 = vmul.f32 %v1768_v27, %v1768_v27 }
0x1007   : > { %v1770_v29 = vsel %vm971_vm2, %v1769_v28, 0.0 }
0x1008   : > { %1771 = vadd.xlane.f32.xlu1 %v1770_v29 }
0x1095   : > { %v1772_v32 = vpop.xlane.xlu1 %1771 }
0x1096   : > { %v1773_v9 = vmul.f32 0.03125, %v1772_v32 }
0x1098   : > { %v1774_v33 = vadd.f32 1e-05, %v1773_v9 }
0x109a   : > { %2713 = vrsqrt.f32 %v1774_v33 }
0x10a4   : > { %v2714_v34 = vpop.eup %2713 }
0x10a5   : > { %v1776_v36 = vmul.f32 %v2714_v34, %v1768_v27 }
0x10a7   : > { %v1783_v37 = vmul.f32 %v2280_v35, %v1776_v36 }
0x10a9   : > { %v1790_v38 = vadd.f32 %v2281_v20, %v1783_v37 }
0x10ab   : > { %v1791_v39 = vpack.c.bf16 %v1790_v38, %v1790_v38 }
0x10ad   : > { %2436 = vmatmul.mubr.msk.bf16.vlgmr.msra.gmra.mrb[32].mxu1 %vm971_vm2, %v1791_v39 }
0x1180   : > { %v1852_v45 = vpop.f32.mrb[32].mxu1 }
0x1181   : > { %v1853_v46 = vadd.f32 %v2282_v44, %v1852_v45  ;;  %v2437_v47 = vpop.f32.mrb[33].mxu1 }
0x1182   : > { %v1855_v48 = vpop.f32.mrb[34].mxu1 }
0x1183   : > { %v2286_v49 = vmul.f32 -1.702, %v1853_v46  ;;  %v2438_v50 = vpop.f32.mrb[35].mxu1 }
0x1185   : > { %v1860_v51 = vmul.f32 1.442695, %v2286_v49 }
0x1187   : > { %2715 = vpow2.f32 %v1860_v51 }
0x1191   : > { %v2716_v52 = vpop.eup %2715 }
0x1192   : > { %v1862_v53 = vadd.f32 1.0, %v2716_v52 }
0x1194   : > { %2717 = vrcp.f32 %v1862_v53 }
0x119e   : > { %v2718_v54 = vpop.eup %2717 }
0x119f   : > { %v1865_v55 = vmul.f32 %v2718_v54, %v1853_v46 }
0x11a1   : > { %v1866_v8 = vpack.c.bf16 %v1865_v55, %v1865_v55 }
0x11a3   : > { %2448 = vmatmul.mubr.msk.bf16.vlgmr.msra.gmra.mrb[28].mxu0 %vm1906_vm9, %v1866_v8 }
0x1276   : > { %v1944_v57 = vpop.f32.mrb[28].mxu0 }
0x1277   : > { %v1945_v58 = vadd.f32 %v2287_v56, %v1944_v57  ;;  %v2449_v59 = vpop.f32.mrb[29].mxu0 }
0x1278   : > { %v1947_v60 = vpop.f32.mrb[30].mxu0 }
0x1279   : > { %v1950_v61 = vadd.f32 %v1945_v58, %v1761_v23  ;;  %v2450_v62 = vpop.f32.mrb[31].mxu0 }
0x127b   : > { %1951 = vst.msk [vmem:[%s839_s23] sm:$0xff] %vm971_vm2, %v1950_v61 }
0x127c   : > { %3240 = shalt.err (!%p3237_p7)
}
0x127d   : > { %s3241_s21 = scalar_lea.hbm %s4132_s26, 128  ;;  %s3245_s27 = scalar_lea.hbm %s4284_s22, 256 }
0x127e   : > { %p3242_p0 = scmp.ne.s32.totalorder %s4132_s26, %s3241_s21  ;;  %p3246_p8 = scmp.lt.u32.totalorder %s4132_s26, %s4284_s22 }
0x127f   : > { %p3247_p9 = scmp.lt.u32.totalorder %s3245_s27, %s3241_s21  ;;  %p3249_p13 = scmp.lt.u32.totalorder %s3241_s21, %s4132_s26 }
0x1280   : > { %p3243_p6 = pnand %p3242_p0, %p4285_p1 }
0x1281   : > { %p3248_p4 = por %p3247_p9, %p3246_p8 }
0x1282   : > { %p3244_p12 = pneg %p3243_p6 }
0x1283   : > { %p3250_p3 = por %p3249_p13, %p3248_p4 }
0x1285   : > { %p3251_p2 = pnand %p3250_p3, %p3244_p12 }
0x1287   : > { %3254 = shalt.err (!%p3251_p2)
}
0x1288   : > { %2519 = dma.vmem_to_hbm [thread:$0]  (%p4285_p1), %s4134_s5, 128, %s4132_s26, %s1953_s6  }
0x1289 PF: > { %s4286_s8 = sld [smem:[#allocation44_spill]]  ;;  %s4287_s23 = sld [smem:[#allocation47_spill]] }
0x128a   : > { %p4288_p10 = scmp.ne.s32.totalorder %s4254_s29, 0 }
0x128f   : > { %s1978_s18 = sand.u32 1, %s4286_s8   ;;  %p4289_p11 = scmp.ge.s32.totalorder %s4287_s23, 2 }
0x1290   : > { %s1979_s0 = scalar_lea.sflag [#allocation4], %s1978_s18 }
0x1291   : > { %p2578_p5 = pnand %p4289_p11, %p4288_p10 }
0x1293   : > { %3316 = dma.done.wait (!%p2578_p5), %s1979_s0, 128  }
0x1294   : > { %3318 = vsyncadd (!%p2578_p5), %s1979_s0, 4294967168  ;;  %s4290_s27 = sld [smem:[#allocation45_spill]]  ;;  %s4291_s28 = sld [smem:[#allocation46_spill]] }
0x1295   : > { %p42_p7 = scmp.ge.s32.totalorder %s3840_s2, 4   ;;  %s4292_s29 = smov %s3851_s20 }
0x1296   : > { %s4293_s30 = smov %s3840_s2 }
0x1297   :  { %44 = sbr.rel (!%p42_p7) target bundleno = 28 (0x1c), region = 214 }
0x129e   :  { %1984 = vsyncpa [#allocation3], 1 }
0x129f   :  { %1986 = vsyncpa [#allocation3 + $0x1], 1 }
0x12a0   :  { %1987 = vsyncpa [#allocation6], 1 }
0x12a1   :  { %1989 = vsyncpa [#allocation6 + $0x1], 1 }
0x12a2   :  { %1990 = vsyncpa [#allocation9], 1 }
0x12a3   :  { %1991 = vsyncpa [#allocation12], 1 }
0x12a4   :  { %1992 = vsyncpa [#allocation15], 1 }
0x12a5   :  { %1993 = vsyncpa [#allocation18], 1 }
0x12a6   :  { %1994 = vsyncpa [#allocation21], 1 }
0x12a7   :  { %1995 = vsyncpa [#allocation24], 1 }
0x12a8   :  { %1996 = vsyncpa [#allocation27], 1 }
0x12a9   :  { %1997 = vsyncpa [#allocation30], 1 }
0x12aa   :  { %1998 = vsyncpa [#allocation4], 1 }
0x12ab   :  { %2000 = vsyncpa [#allocation4 + $0x1], 1 }

</bundles_post_ra>
